<compile_context>
chip_gen: v6e
topology: v6e:2x2x1
jax: 0.10.0
libtpu: 0.0.40
codegen_flags: <defaults>
</compile_context>

<pallas_src>
import functools

import jax
import jax.numpy as jnp
from jax.experimental import pallas as pl
from jax.experimental.pallas import tpu as pltpu


def _round_up(x, m):
    return ((x + m - 1) // m) * m


def _gnn_layer_kernel(a_ref, x_ref, w_ref, b_ref, out_ref, h_ref, *, gcn_dim):
    """One GCN layer per grid step (the layer axis is sequential).

    a_ref   : [Np, Np]        bf16 normalized adjacency (resident, constant)
    x_ref   : [Np, F]         bf16 zero-padded input features (resident, constant)
    w_ref   : [1, F, gcn_dim] bf16 this layer's weight (rows >= in_dim zero-padded)
    b_ref   : [1, 1, gcn_dim] f32 this layer's bias
    out_ref : [Np, gcn_dim]   f32 column slab l*gcn:(l+1)*gcn of the output
    h_ref   : [Np, gcn_dim]   f32 VMEM scratch carrying the activation across layers
    """
    layer = pl.program_id(0)
    w = w_ref[0]                                              # [F, gcn_dim]

    # H_{l-1} @ W_l : bf16 operands, f32 accumulation on the MXU.
    @pl.when(layer == 0)
    def _():
        h_ref[...] = jnp.dot(x_ref[...], w, preferred_element_type=jnp.float32)

    @pl.when(layer > 0)
    def _():
        h_ref[...] = jnp.dot(
            h_ref[...].astype(jnp.bfloat16),
            w[:gcn_dim, :],                                   # layers >= 1 only use gcn_dim rows
            preferred_element_type=jnp.float32,
        )

    # A_norm @ (H W) + b, tanh.  Dropout is identity in eval mode.
    out = jnp.tanh(
        jnp.dot(a_ref[...], h_ref[...].astype(jnp.bfloat16),
                preferred_element_type=jnp.float32)
        + b_ref[0]
    )
    out_ref[...] = out.astype(out_ref.dtype)
    h_ref[...] = out                                          # carry into the next layer


def build_gcn_adjacency(edge_index, num_nodes):
    """Dense D^-1/2 (A + I) D^-1/2, matching PyG GCNConv's gcn_norm."""
    src = edge_index[0]
    dst = edge_index[1]
    a = jnp.zeros((num_nodes, num_nodes), jnp.float32)
    a = a.at[dst, src].add(1.0)                       # message src -> dst
    a = a + jnp.eye(num_nodes, dtype=jnp.float32)     # add self loops
    deg = jnp.sum(a, axis=1)                          # in-degree + 1
    dinv = jnp.where(deg > 0, 1.0 / jnp.sqrt(deg), 0.0)
    return dinv[:, None] * a * dinv[None, :]


def gnn_net_forward(x, a_norm, weights, biases):
    """x: [N, node_dim], a_norm: [N, N].  Returns [N, n_layers, gcn_dim]."""
    N, node_dim = x.shape
    L = len(weights)
    gcn_dim = weights[0].shape[1]

    Np = _round_up(N, 128)                            # lane-dense node axis
    F = max(_round_up(node_dim, 128), gcn_dim)        # common (padded) input width

    # Glue (hoistable / cacheable by the caller): zero-pad to aligned shapes and
    # cast the MXU operands to bf16 (halves A's HBM traffic and VMEM footprint).
    a_pad = jnp.zeros((Np, Np), jnp.bfloat16).at[:N, :N].set(a_norm.astype(jnp.bfloat16))
    x_pad = jnp.zeros((Np, F), jnp.bfloat16).at[:N, :node_dim].set(x.astype(jnp.bfloat16))
    w_all = jnp.stack([
        jnp.zeros((F, gcn_dim), jnp.bfloat16).at[:w.shape[0], :].set(w.astype(jnp.bfloat16))
        for w in weights
    ])                                                                   # [L, F, gcn]
    b_all = jnp.stack([b.astype(jnp.float32).reshape(1, gcn_dim) for b in biases])  # [L,1,gcn]

    kernel = functools.partial(_gnn_layer_kernel, gcn_dim=gcn_dim)
    const2d = lambda l: (0, 0)

    # Scoped-VMEM budget (conservatively assume double-buffering everywhere, then
    # add headroom); default limits (16 MiB v5e / 32 MiB v6e,v7x) are too small
    # for large graphs even though the chips have far more physical VMEM.
    bytes_needed = (
        2 * 2 * Np * Np            # A (bf16)
        + 2 * 2 * Np * F           # X (bf16)
        + 2 * 2 * F * gcn_dim      # per-layer W (bf16)
        + 2 * 4 * gcn_dim          # per-layer bias (f32)
        + 2 * 4 * Np * gcn_dim     # output slab (f32)
        + 4 * Np * gcn_dim         # activation carry scratch (f32)
    )
    vmem_limit = int(min(max(bytes_needed * 1.5 + (2 << 20), 32 << 20), 100 << 20))

    def call(single_buffer_constants):
        # A and X are fetched once (constant index maps); single-buffering them
        # halves their resident VMEM.
        resident = dict(pipeline_mode=pl.Buffered(1)) if single_buffer_constants else {}
        grid_spec = pltpu.PrefetchScalarGridSpec(
            num_scalar_prefetch=0,
            grid=(L,),
            in_specs=[
                pl.BlockSpec((Np, Np), const2d, **resident),          # normalized adjacency
                pl.BlockSpec((Np, F), const2d, **resident),           # padded node features
                pl.BlockSpec((1, F, gcn_dim), lambda l: (l, 0, 0)),   # per-layer weight
                pl.BlockSpec((1, 1, gcn_dim), lambda l: (l, 0, 0)),   # per-layer bias
            ],
            out_specs=pl.BlockSpec((Np, gcn_dim), lambda l: (0, l)),  # lane-dense layer slab
            scratch_shapes=[pltpu.VMEM((Np, gcn_dim), jnp.float32)],  # activation carry
        )
        out2d = pl.pallas_call(
            kernel,
            out_shape=jax.ShapeDtypeStruct((Np, L * gcn_dim), jnp.float32),
            grid_spec=grid_spec,
            compiler_params=pltpu.CompilerParams(
                dimension_semantics=("arbitrary",),                   # layers are sequential
                vmem_limit_bytes=vmem_limit),
        )(a_pad, x_pad, w_all, b_all)
        return jax.block_until_ready(out2d)

    try:
        out2d = call(True)
    except Exception:
        # Some jaxlibs reject pipeline_mode on pallas_call BlockSpecs; the default
        # double-buffered path is still correct (just 2x VMEM for the constants).
        out2d = call(False)

    # (Np, L*gcn) -> drop padded rows -> free reshape to the PyTorch layout [N, L, gcn].
    return out2d[:N].reshape(N, L, gcn_dim)


def _reference(x, a_norm, weights, biases):
    """Pure-JAX f32 reference mirroring GNNNet.forward (eval mode)."""
    outs = []
    h = x.astype(jnp.float32)
    for w, b in zip(weights, biases):
        h = jnp.tanh(a_norm @ (h @ w) + b)
        outs.append(h)
    return jnp.stack(outs, axis=1)


def _xavier_uniform(key, fan_in, fan_out):
    limit = jnp.sqrt(6.0 / (fan_in + fan_out))
    return jax.random.uniform(key, (fan_in, fan_out), jnp.float32, -limit, limit)


if __name__ == "__main__":
    # small graph: N nodes, node feature dim, GCN hidden dim, number of GCN layers
    N, node_dim, gcn_dim, n_layers = 64, 96, 128, 3
    E = 256

    key = jax.random.PRNGKey(0)
    kx, ke1, ke2, *kw = jax.random.split(key, 3 + 2 * n_layers)

    x = jax.random.normal(kx, (N, node_dim), jnp.float32)
    src = jax.random.randint(ke1, (E,), 0, N)
    dst = jax.random.randint(ke2, (E,), 0, N)
    edge_index = jnp.stack([src, dst])                    # [2, E]

    a_norm = build_gcn_adjacency(edge_index, N)

    # GCNConv weights in (in, out) layout; xavier_uniform like the module (dim > 1).
    # Biases are random (GCNConv inits them to zero, but the kernel must handle any).
    weights, biases = [], []
    in_dim = node_dim
    for l in range(n_layers):
        kwl, kbl = kw[2 * l], kw[2 * l + 1]
        weights.append(_xavier_uniform(kwl, in_dim, gcn_dim))
        biases.append(jax.random.uniform(kbl, (gcn_dim,), jnp.float32, -0.1, 0.1))
        in_dim = gcn_dim

    out = gnn_net_forward(x, a_norm, weights, biases)
    out = jax.block_until_ready(out)

    ref = _reference(x, a_norm, weights, biases)
    assert out.shape == (N, n_layers, gcn_dim)
    # bf16 MXU operands (f32 accumulation): ~1e-3..1e-2 absolute error expected.
    err = float(jnp.max(jnp.abs(out - ref)))
    assert jnp.allclose(out, ref, atol=2e-2, rtol=2e-2), err

    print("KERNEL_OK")
</pallas_src>

<mosaic_0001>
module attributes {stable_mosaic.version = 11 : i64} {
  func.func @_gnn_layer_kernel(%arg0: i32, %arg1: memref<128x128xbf16, #tpu.memory_space<vmem>>, %arg2: memref<128x128xbf16, #tpu.memory_space<vmem>>, %arg3: memref<1x128x128xbf16, #tpu.memory_space<vmem>>, %arg4: memref<1x1x128xf32, #tpu.memory_space<vmem>>, %arg5: memref<128x128xf32, #tpu.memory_space<vmem>>, %arg6: memref<128x128xf32, #tpu.memory_space<vmem>>) attributes {dimension_semantics = [#tpu.dimension_semantics<arbitrary>], iteration_bounds = array<i64: 3>, scalar_prefetch = 0 : i64, scratch_operands = 1 : i64, tpu.core_type = #tpu.core_type<tc>, window_params = [{pipeline_mode = #tpu.pipeline_mode<synchronous>, transform_indices = @transform_0, window_bounds = array<i64: 128, 128>}, {pipeline_mode = #tpu.pipeline_mode<synchronous>, transform_indices = @transform_1, window_bounds = array<i64: 128, 128>}, {transform_indices = @transform_2, window_bounds = array<i64: 1, 128, 128>}, {transform_indices = @transform_3, window_bounds = array<i64: 1, 1, 128>}, {transform_indices = @transform_4, window_bounds = array<i64: 128, 128>}]} {
    %c0 = arith.constant 0 : index
    %c0_0 = arith.constant 0 : index
    %c0_1 = arith.constant 0 : index
    %0 = vector.load %arg3[%c0, %c0_0, %c0_1] : memref<1x128x128xbf16, #tpu.memory_space<vmem>>, vector<1x128x128xbf16>
    %1 = vector.shape_cast %0 : vector<1x128x128xbf16> to vector<128x128xbf16>
    %c0_i32 = arith.constant 0 : i32
    %2 = arith.cmpi eq, %arg0, %c0_i32 : i32
    %3 = arith.extui %2 : i1 to i32
    %c0_i32_2 = arith.constant 0 : i32
    %4 = arith.cmpi ne, %3, %c0_i32_2 : i32
    scf.if %4 {
      %c0_16 = arith.constant 0 : index
      %c0_17 = arith.constant 0 : index
      %19 = vector.load %arg2[%c0_16, %c0_17] : memref<128x128xbf16, #tpu.memory_space<vmem>>, vector<128x128xbf16>
      %cst_18 = arith.constant dense<0.000000e+00> : vector<128x128xf32>
      %20 = tpu.matmul %19, %1, %cst_18 {dimension_numbers = #tpu.dot_dimension_numbers<[1], [0], [0], [1], [0, 0, 1, 1], [], []>} : vector<128x128xbf16>, vector<128x128xbf16>, vector<128x128xf32> -> vector<128x128xf32>
      %c0_19 = arith.constant 0 : index
      %c0_20 = arith.constant 0 : index
      %21 = vector.load %arg6[%c0_19, %c0_20] : memref<128x128xf32, #tpu.memory_space<vmem>>, vector<128x128xf32>
      tpu.vector_store %arg6[%c0_19, %c0_20], %20 {strides = array<i32>} : memref<128x128xf32, #tpu.memory_space<vmem>>, vector<128x128xf32>,
    } else {
    }
    %c0_i32_3 = arith.constant 0 : i32
    %5 = arith.cmpi sgt, %arg0, %c0_i32_3 : i32
    %6 = arith.extui %5 : i1 to i32
    %c0_i32_4 = arith.constant 0 : i32
    %7 = arith.cmpi ne, %6, %c0_i32_4 : i32
    scf.if %7 {
      %c0_16 = arith.constant 0 : index
      %c0_17 = arith.constant 0 : index
      %19 = vector.load %arg6[%c0_16, %c0_17] : memref<128x128xf32, #tpu.memory_space<vmem>>, vector<128x128xf32>
      %20 = arith.truncf %19 : vector<128x128xf32> to vector<128x128xbf16>
      %cst_18 = arith.constant dense<0.000000e+00> : vector<128x128xf32>
      %21 = tpu.matmul %20, %1, %cst_18 {dimension_numbers = #tpu.dot_dimension_numbers<[1], [0], [0], [1], [0, 0, 1, 1], [], []>} : vector<128x128xbf16>, vector<128x128xbf16>, vector<128x128xf32> -> vector<128x128xf32>
      %c0_19 = arith.constant 0 : index
      %c0_20 = arith.constant 0 : index
      %22 = vector.load %arg6[%c0_19, %c0_20] : memref<128x128xf32, #tpu.memory_space<vmem>>, vector<128x128xf32>
      tpu.vector_store %arg6[%c0_19, %c0_20], %21 {strides = array<i32>} : memref<128x128xf32, #tpu.memory_space<vmem>>, vector<128x128xf32>,
    } else {
    }
    %c0_5 = arith.constant 0 : index
    %c0_6 = arith.constant 0 : index
    %8 = vector.load %arg1[%c0_5, %c0_6] : memref<128x128xbf16, #tpu.memory_space<vmem>>, vector<128x128xbf16>
    %c0_7 = arith.constant 0 : index
    %c0_8 = arith.constant 0 : index
    %9 = vector.load %arg6[%c0_7, %c0_8] : memref<128x128xf32, #tpu.memory_space<vmem>>, vector<128x128xf32>
    %10 = arith.truncf %9 : vector<128x128xf32> to vector<128x128xbf16>
    %cst = arith.constant dense<0.000000e+00> : vector<128x128xf32>
    %11 = tpu.matmul %8, %10, %cst {dimension_numbers = #tpu.dot_dimension_numbers<[1], [0], [0], [1], [0, 0, 1, 1], [], []>} : vector<128x128xbf16>, vector<128x128xbf16>, vector<128x128xf32> -> vector<128x128xf32>
    %c0_9 = arith.constant 0 : index
    %c0_10 = arith.constant 0 : index
    %c0_11 = arith.constant 0 : index
    %12 = vector.load %arg4[%c0_9, %c0_10, %c0_11] : memref<1x1x128xf32, #tpu.memory_space<vmem>>, vector<1x1x128xf32>
    %13 = vector.shape_cast %12 : vector<1x1x128xf32> to vector<1x128xf32>
    %14 = vector.broadcast %13 : vector<1x128xf32> to vector<128x128xf32>
    %15 = arith.addf %11, %14 : vector<128x128xf32>
    %16 = math.tanh %15 : vector<128x128xf32>
    %c0_12 = arith.constant 0 : index
    %c0_13 = arith.constant 0 : index
    %17 = vector.load %arg5[%c0_12, %c0_13] : memref<128x128xf32, #tpu.memory_space<vmem>>, vector<128x128xf32>
    tpu.vector_store %arg5[%c0_12, %c0_13], %16 {strides = array<i32>} : memref<128x128xf32, #tpu.memory_space<vmem>>, vector<128x128xf32>,
    %c0_14 = arith.constant 0 : index
    %c0_15 = arith.constant 0 : index
    %18 = vector.load %arg6[%c0_14, %c0_15] : memref<128x128xf32, #tpu.memory_space<vmem>>, vector<128x128xf32>
    tpu.vector_store %arg6[%c0_14, %c0_15], %16 {strides = array<i32>} : memref<128x128xf32, #tpu.memory_space<vmem>>, vector<128x128xf32>,
    return
  }
  func.func @transform_0(%arg0: i32) -> (i32, i32) {
    %c0_i32 = arith.constant 0 : i32
    %c0_i32_0 = arith.constant 0 : i32
    %c0_i32_1 = arith.constant 0 : i32
    return %c0_i32, %c0_i32_0 : i32, i32
  }
  func.func @transform_1(%arg0: i32) -> (i32, i32) {
    %c0_i32 = arith.constant 0 : i32
    %c0_i32_0 = arith.constant 0 : i32
    %c0_i32_1 = arith.constant 0 : i32
    return %c0_i32, %c0_i32_0 : i32, i32
  }
  func.func @transform_2(%arg0: i32) -> (i32, i32, i32) {
    %c0_i32 = arith.constant 0 : i32
    %c0_i32_0 = arith.constant 0 : i32
    %c0_i32_1 = arith.constant 0 : i32
    return %arg0, %c0_i32, %c0_i32_0 : i32, i32, i32
  }
  func.func @transform_3(%arg0: i32) -> (i32, i32, i32) {
    %c0_i32 = arith.constant 0 : i32
    %c0_i32_0 = arith.constant 0 : i32
    %c0_i32_1 = arith.constant 0 : i32
    return %arg0, %c0_i32, %c0_i32_0 : i32, i32, i32
  }
  func.func @transform_4(%arg0: i32) -> (i32, i32) {
    %c0_i32 = arith.constant 0 : i32
    %c0_i32_0 = arith.constant 0 : i32
    return %c0_i32, %arg0 : i32, i32
  }
}

module attributes {stable_mosaic.version = 11 : i64} {
  func.func @_gnn_layer_kernel(%arg0: i32, %arg1: memref<128x128xbf16, #tpu.memory_space<vmem>>, %arg2: memref<128x128xbf16, #tpu.memory_space<vmem>>, %arg3: memref<1x128x128xbf16, #tpu.memory_space<vmem>>, %arg4: memref<1x1x128xf32, #tpu.memory_space<vmem>>, %arg5: memref<128x128xf32, #tpu.memory_space<vmem>>, %arg6: memref<128x128xf32, #tpu.memory_space<vmem>>) attributes {dimension_semantics = [#tpu.dimension_semantics<arbitrary>], iteration_bounds = array<i64: 3>, scalar_prefetch = 0 : i64, scratch_operands = 1 : i64, tpu.core_type = #tpu.core_type<tc>, window_params = [{pipeline_mode = #tpu.pipeline_mode<synchronous>, transform_indices = @transform_0, window_bounds = array<i64: 128, 128>}, {pipeline_mode = #tpu.pipeline_mode<synchronous>, transform_indices = @transform_1, window_bounds = array<i64: 128, 128>}, {transform_indices = @transform_2, window_bounds = array<i64: 1, 128, 128>}, {transform_indices = @transform_3, window_bounds = array<i64: 1, 1, 128>}, {transform_indices = @transform_4, window_bounds = array<i64: 128, 128>}]} {
    %c0 = arith.constant 0 : index
    %c0_0 = arith.constant 0 : index
    %c0_1 = arith.constant 0 : index
    %0 = vector.load %arg3[%c0, %c0_0, %c0_1] : memref<1x128x128xbf16, #tpu.memory_space<vmem>>, vector<1x128x128xbf16>
    %1 = vector.shape_cast %0 : vector<1x128x128xbf16> to vector<128x128xbf16>
    %c0_i32 = arith.constant 0 : i32
    %2 = arith.cmpi eq, %arg0, %c0_i32 : i32
    %3 = arith.extui %2 : i1 to i32
    %c0_i32_2 = arith.constant 0 : i32
    %4 = arith.cmpi ne, %3, %c0_i32_2 : i32
    scf.if %4 {
      %c0_16 = arith.constant 0 : index
      %c0_17 = arith.constant 0 : index
      %19 = vector.load %arg2[%c0_16, %c0_17] : memref<128x128xbf16, #tpu.memory_space<vmem>>, vector<128x128xbf16>
      %cst_18 = arith.constant dense<0.000000e+00> : vector<128x128xf32>
      %20 = tpu.matmul %19, %1, %cst_18 {dimension_numbers = #tpu.dot_dimension_numbers<[1], [0], [0], [1], [0, 0, 1, 1], [], []>} : vector<128x128xbf16>, vector<128x128xbf16>, vector<128x128xf32> -> vector<128x128xf32>
      %c0_19 = arith.constant 0 : index
      %c0_20 = arith.constant 0 : index
      %21 = vector.load %arg6[%c0_19, %c0_20] : memref<128x128xf32, #tpu.memory_space<vmem>>, vector<128x128xf32>
      tpu.vector_store %arg6[%c0_19, %c0_20], %20 {strides = array<i32>} : memref<128x128xf32, #tpu.memory_space<vmem>>, vector<128x128xf32>,
    } else {
    }
    %c0_i32_3 = arith.constant 0 : i32
    %5 = arith.cmpi sgt, %arg0, %c0_i32_3 : i32
    %6 = arith.extui %5 : i1 to i32
    %c0_i32_4 = arith.constant 0 : i32
    %7 = arith.cmpi ne, %6, %c0_i32_4 : i32
    scf.if %7 {
      %c0_16 = arith.constant 0 : index
      %c0_17 = arith.constant 0 : index
      %19 = vector.load %arg6[%c0_16, %c0_17] : memref<128x128xf32, #tpu.memory_space<vmem>>, vector<128x128xf32>
      %20 = arith.truncf %19 : vector<128x128xf32> to vector<128x128xbf16>
      %cst_18 = arith.constant dense<0.000000e+00> : vector<128x128xf32>
      %21 = tpu.matmul %20, %1, %cst_18 {dimension_numbers = #tpu.dot_dimension_numbers<[1], [0], [0], [1], [0, 0, 1, 1], [], []>} : vector<128x128xbf16>, vector<128x128xbf16>, vector<128x128xf32> -> vector<128x128xf32>
      %c0_19 = arith.constant 0 : index
      %c0_20 = arith.constant 0 : index
      %22 = vector.load %arg6[%c0_19, %c0_20] : memref<128x128xf32, #tpu.memory_space<vmem>>, vector<128x128xf32>
      tpu.vector_store %arg6[%c0_19, %c0_20], %21 {strides = array<i32>} : memref<128x128xf32, #tpu.memory_space<vmem>>, vector<128x128xf32>,
    } else {
    }
    %c0_5 = arith.constant 0 : index
    %c0_6 = arith.constant 0 : index
    %8 = vector.load %arg1[%c0_5, %c0_6] : memref<128x128xbf16, #tpu.memory_space<vmem>>, vector<128x128xbf16>
    %c0_7 = arith.constant 0 : index
    %c0_8 = arith.constant 0 : index
    %9 = vector.load %arg6[%c0_7, %c0_8] : memref<128x128xf32, #tpu.memory_space<vmem>>, vector<128x128xf32>
    %10 = arith.truncf %9 : vector<128x128xf32> to vector<128x128xbf16>
    %cst = arith.constant dense<0.000000e+00> : vector<128x128xf32>
    %11 = tpu.matmul %8, %10, %cst {dimension_numbers = #tpu.dot_dimension_numbers<[1], [0], [0], [1], [0, 0, 1, 1], [], []>} : vector<128x128xbf16>, vector<128x128xbf16>, vector<128x128xf32> -> vector<128x128xf32>
    %c0_9 = arith.constant 0 : index
    %c0_10 = arith.constant 0 : index
    %c0_11 = arith.constant 0 : index
    %12 = vector.load %arg4[%c0_9, %c0_10, %c0_11] : memref<1x1x128xf32, #tpu.memory_space<vmem>>, vector<1x1x128xf32>
    %13 = vector.shape_cast %12 : vector<1x1x128xf32> to vector<1x128xf32>
    %14 = vector.broadcast %13 : vector<1x128xf32> to vector<128x128xf32>
    %15 = arith.addf %11, %14 : vector<128x128xf32>
    %16 = math.tanh %15 : vector<128x128xf32>
    %c0_12 = arith.constant 0 : index
    %c0_13 = arith.constant 0 : index
    %17 = vector.load %arg5[%c0_12, %c0_13] : memref<128x128xf32, #tpu.memory_space<vmem>>, vector<128x128xf32>
    tpu.vector_store %arg5[%c0_12, %c0_13], %16 {strides = array<i32>} : memref<128x128xf32, #tpu.memory_space<vmem>>, vector<128x128xf32>,
    %c0_14 = arith.constant 0 : index
    %c0_15 = arith.constant 0 : index
    %18 = vector.load %arg6[%c0_14, %c0_15] : memref<128x128xf32, #tpu.memory_space<vmem>>, vector<128x128xf32>
    tpu.vector_store %arg6[%c0_14, %c0_15], %16 {strides = array<i32>} : memref<128x128xf32, #tpu.memory_space<vmem>>, vector<128x128xf32>,
    return
  }
  func.func @transform_0(%arg0: i32) -> (i32, i32) {
    %c0_i32 = arith.constant 0 : i32
    %c0_i32_0 = arith.constant 0 : i32
    %c0_i32_1 = arith.constant 0 : i32
    return %c0_i32, %c0_i32_0 : i32, i32
  }
  func.func @transform_1(%arg0: i32) -> (i32, i32) {
    %c0_i32 = arith.constant 0 : i32
    %c0_i32_0 = arith.constant 0 : i32
    %c0_i32_1 = arith.constant 0 : i32
    return %c0_i32, %c0_i32_0 : i32, i32
  }
  func.func @transform_2(%arg0: i32) -> (i32, i32, i32) {
    %c0_i32 = arith.constant 0 : i32
    %c0_i32_0 = arith.constant 0 : i32
    %c0_i32_1 = arith.constant 0 : i32
    return %arg0, %c0_i32, %c0_i32_0 : i32, i32, i32
  }
  func.func @transform_3(%arg0: i32) -> (i32, i32, i32) {
    %c0_i32 = arith.constant 0 : i32
    %c0_i32_0 = arith.constant 0 : i32
    %c0_i32_1 = arith.constant 0 : i32
    return %arg0, %c0_i32, %c0_i32_0 : i32, i32, i32
  }
  func.func @transform_4(%arg0: i32) -> (i32, i32) {
    %c0_i32 = arith.constant 0 : i32
    %c0_i32_0 = arith.constant 0 : i32
    return %c0_i32, %arg0 : i32, i32
  }
}

</mosaic_0001>

<bundles_post_ra>
// kernel: tpu_custom_call.1
= control target key start
LH: loop header
LB: loop body
LE: loop exit
PB: predicated region body
PF: predicated region fallthrough
CT: control target
= control target key end

     0   :  { %9 = vsyncpa [#allocation4], 0  ;;  %s1906_s0 = inlined_call_operand.hbm [shape: bf16[128,128], index: 0, kind: input, shape index: {}]   ;;  %s1907_s1 = inlined_call_operand.hbm [shape: bf16[128,128], index: 1, kind: input, shape index: {}]   ;;  %s1908_s2 = inlined_call_operand.hbm [shape: bf16[3,128,128], index: 2, kind: input, shape index: {}]   ;;  %s1909_s3 = inlined_call_operand.vmem [shape: f32[3,1,128], index: 3, kind: input, shape index: {}]   ;;  %s1910_s4 = inlined_call_operand.hbm [shape: f32[128,384], index: 4, kind: output, shape index: {}]  }
   0x1   :  { %10 = vsyncpa [#allocation7], 0 }
   0x2   :  { %11 = vsyncpa [#allocation5], 0 }
   0x3   :  { %13 = vsyncpa [#allocation5 + $0x1], 0  ;;  %s1599_s15 = smov 0   ;;  %s1601_s16 = smov 0  }
   0x4   :  { %s1603_s17 = smov 0   ;;  %s1605_s18 = smov 0  }
   0x5 LB: > { %s1620_s19 = sadd.s32 4294967295, %s1563_s18   ;;  %s1046_s20 = sadd.s32 4294967294, %s1563_s18   ;;  %s1563_s18 = sphi %s1605_s18, %s1934_s18   ;;  %s1559_s17 = sphi %s1603_s17, %s1933_s17   ;;  %s1555_s16 = sphi %s1601_s16, %s1932_s16   ;;  %s1551_s15 = sphi %s1599_s15, %s1931_s15  }
   0x6   : > { %s1624_s21 = sadd.s32 1, %s1563_s18   ;;  %s68_s22 = sadd.s32 1, %s1559_s17 }
   0x7   : > { %s65_s23 = ssub.s32 %s1563_s18, %s1624_s21  ;;  %p75_p0 = scmp.ne.s32.totalorder %s1559_s17, %s1555_s16 }
   0x8   : > { %p66_p1 = scmp.eq.s32.totalorder %s65_s23, 0  ;;  %p76_p2 = scmp.eq.s32.totalorder %s1563_s18, 0 }
   0x9   : > { %p81_p3 = scmp.ne.s32.totalorder %s1555_s16, %s1551_s15  ;;  %p1912_p4 = scmp.eq.s32.totalorder %s1620_s19, 0 }
   0xa   : > { %s1636_s24 = scalar_select %p66_p1, %s1559_s17, %s68_s22  }
   0xb   : > { %p1638_p5 = por %p76_p2, %p75_p0  ;;  %p1644_p6 = por %p1912_p4, %p81_p3 }
   0xc   : > { %p131_p7 = scmp.eq.s32.totalorder %s1620_s19, 2  ;;  %p137_p8 = scmp.eq.s32.totalorder %s1046_s20, 2 }
   0xd   : > { %s1916_s26 = scalar_select %p1644_p6, 1, 0 }
   0xe   : > { %p1047_p9 = scmp.ge.s32.totalorder %s1563_s18, 1  ;;  %p144_p10 = scmp.lt.s32.totalorder %s1563_s18, 4 }
   0xf   : > { %p1651_p11 = por %p131_p7, %p75_p0  ;;  %p1655_p12 = por %p137_p8, %p81_p3 }
  0x10   : > { %p1659_p13 = pnand %p1047_p9, %p144_p10  ;;  %s1565_s30 = smov [#allocation3]  }
  0x11   : > { %s1917_s27 = scalar_select %p1651_p11, 1, 0 }
  0x12   : > { %s1918_s28 = scalar_select %p1655_p12, 1, 0 }
  0x13   : > { %s1919_s29 = scalar_select %p1659_p13, 1, 0 }
  0x14   : > { %p1303_p2 = pneg %p1659_p13  ;;  %s156_s5 = sshll.u32 %s1565_s30, 4  ;;  %s157_s5 = int_to_ptr.vmem [resolvable:$true] %s156_s5 }
  0x15   : > { %p1320_p3 = scmp.lt.s32.totalorder %s1563_s18, 3  ;;  %s1566_s7 = smov [#allocation6]  }
  0x16   : > { %p1668_p0 = pnand %p1303_p2, %p1912_p4  ;;  %s169_s8 = sshll.u32 %s1566_s7, 4  ;;  %s170_s8 = int_to_ptr.vmem [resolvable:$true] %s169_s8 }
  0x17   : > { %s1422_s9 = scalar_lea.vmem %s157_s5, 1024  ;;  %p1430_p1 = scmp.lt.s32.totalorder %s157_s5, %s157_s5 }
  0x18   : > { %p1413_p7 = pneg %p1668_p0  ;;  %p1423_p8 = scmp.ne.s32.totalorder %s157_s5, %s1422_s9 }
  0x19   : > { %p1431_p12 = scmp.lt.s32.totalorder %s1422_s9, %s1422_s9 }
  0x1a   : > { %p1425_p9 = pnand %p1423_p8, %p1413_p7 }
  0x1b   : > { %p1432_p11 = por %p1431_p12, %p1430_p1 }
  0x1c   : > { %p1426_p10 = pneg %p1425_p9 }
  0x1e   : > { %p1433_p2 = pnand %p1432_p11, %p1426_p10 }
  0x20   : > { %1436 = shalt.err (!%p1433_p2)
}
  0x21   : > { %s1567_s10 = smov 64   ;;  %s1568_s11 = smov 4  }
  0x22   : > { %1306 = dma.hbm_to_vmem [thread:$0]  (!%p1668_p0), %s1906_s0, 1024, %s157_s5, [#allocation4], %s1567_s10, %s1567_s10, %s1568_s11  }
  0x23   : > { %p1690_p8 = pnand %p1320_p3, %p1638_p5  ;;  %s1448_s20 = scalar_lea.vmem %s170_s8, 1024 }
  0x24   : > { %p1449_p11 = scmp.ne.s32.totalorder %s170_s8, %s1448_s20  ;;  %p1456_p9 = scmp.lt.s32.totalorder %s170_s8, %s170_s8 }
  0x25   : > { %p1457_p10 = scmp.lt.s32.totalorder %s1448_s20, %s1448_s20 }
  0x26   : > { %p1451_p12 = pnand %p1449_p11, %p1413_p7 }
  0x27   : > { %p1458_p2 = por %p1457_p10, %p1456_p9 }
  0x28   : > { %p1452_p1 = pneg %p1451_p12 }
  0x2a   : > { %p1459_p4 = pnand %p1458_p2, %p1452_p1 }
  0x2c   : > { %1462 = shalt.err (!%p1459_p4)
}
  0x2d   : > { %1309 = dma.hbm_to_vmem [thread:$0]  (!%p1668_p0), %s1907_s1, 1024, %s170_s8, [#allocation7], %s1567_s10, %s1567_s10, %s1568_s11  }
  0x2e   : > { %s183_s25 = sand.u32 1, %s1563_s18   ;;  %s185_s30 = sand.u32 1, %s1559_s17  }
  0x2f   : > { %s1051_s5 = sshll.u32 %s185_s30, 6  ;;  %s1098_s7 = sshll.u32 %s1563_s18, 10 }
  0x30   : > { %s1711_s13 = scalar_lea.hbm %s1908_s2, %s1098_s7  ;;  %s187_s6 = scalar_lea.vmem [#allocation8], %s1051_s5 }
  0x31   : > { %s194_s20 = sshll.u32 %s187_s6, 4  ;;  %s1715_s22 = scalar_lea.sflag [#allocation4], %s183_s25  ;;  %s1713_s20 = int_to_ptr.vmem [resolvable:$true] %s194_s20 }
  0x32   : > { %s1463_s23 = scalar_lea.hbm %s1711_s13, 1024  ;;  %p1465_p5 = pneg %p1690_p8 }
  0x33   : > { %p1464_p4 = scmp.ne.s32.totalorder %s1711_s13, %s1463_s23  ;;  %s1468_s7 = scalar_lea.hbm %s1908_s2, 3072 }
  0x34   : > { %p1469_p7 = scmp.lt.s32.totalorder %s1711_s13, %s1908_s2  ;;  %p1470_p11 = scmp.lt.s32.totalorder %s1468_s7, %s1463_s23 }
  0x35   : > { %p1466_p0 = pnand %p1465_p5, %p1464_p4 }
  0x36   : > { %p1471_p12 = por %p1470_p11, %p1469_p7 }
  0x37   : > { %p1467_p3 = pneg %p1466_p0 }
  0x39   : > { %p1472_p1 = pnand %p1471_p12, %p1467_p3 }
  0x3b   : > { %1475 = shalt.err (!%p1472_p1)
}
  0x3c   : > { %s1476_s25 = scalar_lea.vmem %s1713_s20, 1024  ;;  %s1569_s5 = smov [#allocation8]  }
  0x3d   : > { %p1477_p9 = scmp.ne.s32.totalorder %s1713_s20, %s1476_s25  ;;  %s1481_s6 = sshll.u32 %s1569_s5, 4  ;;  %s1482_s6 = int_to_ptr.vmem [resolvable:$false] %s1481_s6 }
  0x3e   : > { %s1483_s8 = scalar_lea.vmem %s1482_s6, 2048  ;;  %p1484_p4 = scmp.lt.s32.totalorder %s1713_s20, %s1482_s6 }
  0x3f   : > { %p1479_p10 = pnand %p1477_p9, %p1465_p5  ;;  %p1485_p0 = scmp.lt.s32.totalorder %s1483_s8, %s1476_s25 }
  0x41   : > { %p1480_p2 = pneg %p1479_p10  ;;  %p1486_p6 = por %p1485_p0, %p1484_p4 }
  0x43   : > { %p1487_p13 = pnand %p1486_p6, %p1480_p2 }
  0x45   : > { %1490 = shalt.err (!%p1487_p13)
}
  0x46   : > { %1313 = dma.hbm_to_vmem [thread:$0]  (!%p1690_p8), %s1711_s13, 1024, %s1713_s20, %s1715_s22, %s1567_s10, %s1567_s10, %s1568_s11  }
  0x47   : > { %p1922_p5 = scmp.ne.s32.totalorder %s1919_s29, 0 }
  0x48   : > { %p1923_p3 = scmp.eq.s32.totalorder (!%p1922_p5), %s1620_s19, 0 }
  0x49   : > { %212 = sbr.rel (%p1922_p5) target bundleno = 869 (0x365), region = 36 }
  0x4e   : > { %1534 = dma.done.wait (%p1923_p3), [#allocation4], 1024   ;;  %p1924_p7 = pmov %p1923_p3 }
  0x4f   : > { %p1925_p6 = pmov %p1923_p3 }
  0x50   : > { %1536 = vsyncadd (%p1924_p7), [#allocation4], 4294966272 }
  0x51   : > { %1538 = dma.done.wait (%p1925_p6), [#allocation7], 1024   ;;  %p1926_p13 = pmov %p1923_p3 }
  0x52   : > { %s222_s14 = sand.u32 1, %s1620_s19   ;;  %s1751_s10 = sand.u32 1, %s1555_s16  }
  0x53   : > { %1540 = vsyncadd (%p1926_p13), [#allocation7], 4294966272  ;;  %s1057_s29 = sshll.u32 %s1751_s10, 6  ;;  %s223_s11 = scalar_lea.sflag [#allocation4], %s222_s14 }
  0x54   : > { %s226_s13 = scalar_lea.vmem [#allocation8], %s1057_s29  ;;  %p1927_p8 = scmp.ne.s32.totalorder %s1916_s26, 0 }
  0x56   : > { %1542 = dma.done.wait (%p1927_p8), %s223_s11, 1024  }
  0x57   : > { %1544 = vsyncadd (%p1927_p8), %s223_s11, 4294966272  ;;  %s1058_s20 = sshll.u32 %s1751_s10, 7  ;;  %p254_p11 = scmp.lt.s32.totalorder %s1620_s19, 2  ;;  %v1767_v0 = vld [vmem:[%s226_s13] sm:$0xf] }
  0x58   : > { %v1769_v1 = vld [vmem:[%s226_s13 + $0x4] sm:$0xf]  ;;  %v1771_v2 = vld [vmem:[%s226_s13 + $0x8] sm:$0xf]  ;;  %v1773_v3 = vld [vmem:[%s226_s13 + $0xc] sm:$0xf] }
  0x59   : > { %s1761_s22 = scalar_select %p254_p11, %s1620_s19, 2  ;;  %v1775_v4 = vld [vmem:[%s226_s13 + $0x10] sm:$0xf]  ;;  %v1777_v5 = vld [vmem:[%s226_s13 + $0x14] sm:$0xf] }
  0x5a   : > { %v1779_v6 = vld [vmem:[%s226_s13 + $0x18] sm:$0xf]  ;;  %v1781_v7 = vld [vmem:[%s226_s13 + $0x1c] sm:$0xf]  ;;  %v1783_v8 = vld [vmem:[%s226_s13 + $0x20] sm:$0xf] }
  0x5b   : > { %s256_s7 = scalar_lea.vmem %s1909_s3, %s1761_s22  ;;  %v1785_v9 = vld [vmem:[%s226_s13 + $0x24] sm:$0xf]  ;;  %v1787_v10 = vld [vmem:[%s226_s13 + $0x28] sm:$0xf]  ;;  %v1789_v11 = vld [vmem:[%s226_s13 + $0x2c] sm:$0xf] }
  0x5c   : > { %v1791_v12 = vld [vmem:[%s226_s13 + $0x30] sm:$0xf]  ;;  %v1793_v13 = vld [vmem:[%s226_s13 + $0x34] sm:$0xf]  ;;  %v1795_v14 = vld [vmem:[%s226_s13 + $0x38] sm:$0xf] }
  0x5d   : > { %v1797_v15 = vld [vmem:[%s226_s13 + $0x3c] sm:$0xf]  ;;  %s1799_s26 = scalar_lea.vmem [#allocation9], %s1058_s20  ;;  %p1928_p12 = scmp.ne.s32.totalorder %s1620_s19, 0 }
  0x5f   : > { %277 = sbr.rel (%p1928_p12) target bundleno = 342 (0x156), region = 52 }
  0x64   : > { %v1075_v16 = vcombine.low %v1795_v14, %v1797_v15  ;;  %v1074_v17 = vcombine.low %v1791_v12, %v1793_v13  ;;  %v1363_v18 = vld [vmem:[#allocation6] sm:$0xff]   ;;  %v1073_v20 = vcombine.low %v1787_v10, %v1789_v11  ;;  %v1072_v21 = vcombine.low %v1783_v8, %v1785_v9  ;;  %v1365_v26 = vld [vmem:[#allocation6 + $0x8] sm:$0xff]   ;;  %v1367_v28 = vld [vmem:[#allocation6 + $0x10] sm:$0xff]  }
  0x65   : > { %v1364_v19 = vld [vmem:[#allocation6 + $0x20] sm:$0xff]   ;;  %1163 = vmatprep.mubr.bf16.mxu0 %v1363_v18  ;;  %v1071_v22 = vcombine.low %v1779_v6, %v1781_v7  ;;  %v1070_v23 = vcombine.low %v1775_v4, %v1777_v5  ;;  %v1069_v24 = vcombine.low %v1771_v2, %v1773_v3  ;;  %v1068_v25 = vcombine.low %v1767_v0, %v1769_v1  ;;  %v1366_v27 = vld [vmem:[#allocation6 + $0x28] sm:$0xff]   ;;  %v1368_v29 = vld [vmem:[#allocation6 + $0x30] sm:$0xff]  }
  0x66   : > { %1147 = vmatprep.subr.bf16.mxu0 %v1075_v16  ;;  %1243 = vmatprep.subr.bf16.mxu1 %v1075_v16  ;;  %v1369_v30 = vld [vmem:[#allocation6 + $0x18] sm:$0xff]  }
  0x67   : > { %1148 = vmatpush3.bf16.msra.mxu0 %v1075_v16  ;;  %1251 = vmatpush3.bf16.msra.mxu1 %v1075_v16  ;;  %v1370_v31 = vld [vmem:[#allocation6 + $0x38] sm:$0xff]  }
  0x68   : > { %1149 = vmatprep.subr.bf16.mxu0 %v1074_v17  ;;  %1244 = vmatprep.subr.bf16.mxu1 %v1074_v17 }
  0x69   : > { %1171 = vmatprep.mubr.bf16.mxu1 %v1364_v19 }
  0x6b   : > { %1150 = vmatpush3.bf16.msra.mxu0 %v1074_v17  ;;  %1252 = vmatpush3.bf16.msra.mxu1 %v1074_v17 }
  0x6c   : > { %1151 = vmatprep.subr.bf16.mxu0 %v1073_v20  ;;  %1245 = vmatprep.subr.bf16.mxu1 %v1073_v20 }
  0x6f   : > { %1152 = vmatpush3.bf16.msra.mxu0 %v1073_v20  ;;  %1253 = vmatpush3.bf16.msra.mxu1 %v1073_v20 }
  0x70   : > { %1153 = vmatprep.subr.bf16.mxu0 %v1072_v21  ;;  %1246 = vmatprep.subr.bf16.mxu1 %v1072_v21 }
  0x73   : > { %1154 = vmatpush3.bf16.msra.mxu0 %v1072_v21  ;;  %1254 = vmatpush3.bf16.msra.mxu1 %v1072_v21 }
  0x74   : > { %1155 = vmatprep.subr.bf16.mxu0 %v1071_v22  ;;  %1247 = vmatprep.subr.bf16.mxu1 %v1071_v22 }
  0x77   : > { %1156 = vmatpush3.bf16.msra.mxu0 %v1071_v22  ;;  %1255 = vmatpush3.bf16.msra.mxu1 %v1071_v22 }
  0x78   : > { %1157 = vmatprep.subr.bf16.mxu0 %v1070_v23  ;;  %1248 = vmatprep.subr.bf16.mxu1 %v1070_v23 }
  0x7b   : > { %1158 = vmatpush3.bf16.msra.mxu0 %v1070_v23  ;;  %1256 = vmatpush3.bf16.msra.mxu1 %v1070_v23 }
  0x7c   : > { %1159 = vmatprep.subr.bf16.mxu0 %v1069_v24  ;;  %1249 = vmatprep.subr.bf16.mxu1 %v1069_v24 }
  0x7f   : > { %1160 = vmatpush3.bf16.msra.mxu0 %v1069_v24  ;;  %1257 = vmatpush3.bf16.msra.mxu1 %v1069_v24 }
  0x80   : > { %1161 = vmatprep.subr.bf16.mxu0 %v1068_v25  ;;  %1250 = vmatprep.subr.bf16.mxu1 %v1068_v25 }
  0x83   : > { %1162 = vmatpush3.bf16.msra.mxu0 %v1068_v25  ;;  %1258 = vmatpush3.bf16.msra.mxu1 %v1068_v25 }
  0x86   : > { %1164 = vmatmul.mubr.bf16.vlgmr.msra.gmra.mxu0 %v1365_v26  ;;  %1172 = vmatmul.mubr.bf16.vlgmr.msra.gmra.mxu1 %v1366_v27 }
  0x87   : > { %1167 = vmatprep.mubr.bf16.mxu0 %v1367_v28  ;;  %1175 = vmatprep.mubr.bf16.mxu1 %v1368_v29 }
  0x8e   : > { %1168 = vmatmul.mubr.bf16.gmra.mxu0 %v1369_v30  ;;  %1176 = vmatmul.mubr.bf16.gmra.mxu1 %v1370_v31 }
 0x146   : > { %v1165_v32 = vpop.f32.mrf.mxu0  ;;  %v1173_v33 = vpop.f32.mrf.mxu1 }
 0x147   : > { %489 = vst [vmem:[#allocation2 + $0x58] sm:$0xff] %v1165_v32  ;;  %497 = vst [vmem:[#allocation2 + $0x10] sm:$0xff] %v1173_v33 }
 0x148   : > { %v424_v34 = vpop.f32.mrf.mxu0  ;;  %v456_v35 = vpop.f32.mrf.mxu1 }
 0x149   : > { %487 = vst [vmem:[#allocation2 + $0x30] sm:$0xff] %v424_v34  ;;  %495 = vst [vmem:[#allocation2 + $0x40] sm:$0xff] %v456_v35 }
 0x14a   : > { %v1166_v36 = vpop.f32.mrf.mxu0  ;;  %v1174_v37 = vpop.f32.mrf.mxu1 }
 0x14b   : > { %490 = vst [vmem:[#allocation2 + $0x18] sm:$0xff] %v1166_v36  ;;  %498 = vst [vmem:[#allocation2 + $0x38] sm:$0xff] %v1174_v37 }
 0x14c   : > { %v427_v38 = vpop.f32.mrf.mxu0  ;;  %v459_v39 = vpop.f32.mrf.mxu1 }
 0x14d   : > { %488 = vst [vmem:[#allocation2] sm:$0xff] %v427_v38  ;;  %496 = vst [vmem:[#allocation2 + $0x20] sm:$0xff] %v459_v39 }
 0x14e   : > { %v1169_v40 = vpop.f32.mrf.mxu0  ;;  %v1177_v41 = vpop.f32.mrf.mxu1 }
 0x14f   : > { %493 = vst [vmem:[#allocation2 + $0x8] sm:$0xff] %v1169_v40  ;;  %501 = vst [vmem:[#allocation2 + $0x78] sm:$0xff] %v1177_v41 }
 0x150   : > { %v440_v42 = vpop.f32.mrf.mxu0  ;;  %v472_v43 = vpop.f32.mrf.mxu1 }
 0x151   : > { %491 = vst [vmem:[#allocation2 + $0x50] sm:$0xff] %v440_v42  ;;  %499 = vst [vmem:[#allocation2 + $0x60] sm:$0xff] %v472_v43 }
 0x152   : > { %v1170_v44 = vpop.f32.mrf.mxu0  ;;  %v1178_v45 = vpop.f32.mrf.mxu1 }
 0x153   : > { %494 = vst [vmem:[#allocation2 + $0x48] sm:$0xff] %v1170_v44  ;;  %502 = vst [vmem:[#allocation2 + $0x28] sm:$0xff] %v1178_v45 }
 0x154   : > { %v443_v46 = vpop.f32.mrf.mxu0  ;;  %v475_v47 = vpop.f32.mrf.mxu1 }
 0x155   : > { %492 = vst [vmem:[#allocation2 + $0x68] sm:$0xff] %v443_v46  ;;  %500 = vst [vmem:[#allocation2 + $0x70] sm:$0xff] %v475_v47 }
 0x156 PF: > { %p1076_p1 = scmp.le.s32.totalorder %s1620_s19, 0 }
 0x158   : > { %506 = sbr.rel (%p1076_p1) target bundleno = 591 (0x24f), region = 56 }
 0x15d   : > { %v1084_v48 = vcombine.low %v1795_v14, %v1797_v15  ;;  %v1083_v49 = vcombine.low %v1791_v12, %v1793_v13  ;;  %v507_v50 = vld [vmem:[#allocation2 + $0x30] sm:$0xff]  ;;  %v508_v51 = vld [vmem:[#allocation2] sm:$0xff]  ;;  %v1082_v56 = vcombine.low %v1787_v10, %v1789_v11  ;;  %v1081_v57 = vcombine.low %v1783_v8, %v1785_v9  ;;  %v509_v62 = vld [vmem:[#allocation2 + $0x58] sm:$0xff] }
 0x15e   : > { %v515_v52 = vld [vmem:[#allocation2 + $0x40] sm:$0xff]  ;;  %v523_v54 = vpack.c.bf16 %v508_v51, %v507_v50  ;;  %v1080_v58 = vcombine.low %v1779_v6, %v1781_v7  ;;  %v1079_v59 = vcombine.low %v1775_v4, %v1777_v5  ;;  %v1078_v60 = vcombine.low %v1771_v2, %v1773_v3  ;;  %v510_v63 = vld [vmem:[#allocation2 + $0x18] sm:$0xff]  ;;  %v517_v6 = vld [vmem:[#allocation2 + $0x10] sm:$0xff] }
 0x15f   : > { %v516_v53 = vld [vmem:[#allocation2 + $0x20] sm:$0xff]  ;;  %1179 = vmatprep.subr.bf16.mxu0 %v1084_v48  ;;  %1259 = vmatprep.subr.bf16.mxu1 %v1084_v48  ;;  %v1077_v61 = vcombine.low %v1767_v0, %v1769_v1  ;;  %v518_v4 = vld [vmem:[#allocation2 + $0x38] sm:$0xff]  ;;  %v511_v5 = vld [vmem:[#allocation2 + $0x50] sm:$0xff]  ;;  %v524_v2 = vpack.c.bf16 %v510_v63, %v509_v62 }
 0x160   : > { %v527_v55 = vpack.c.bf16 %v516_v53, %v515_v52  ;;  %1180 = vmatpush3.bf16.msra.mxu0 %v1084_v48  ;;  %1267 = vmatpush3.bf16.msra.mxu1 %v1084_v48  ;;  %v512_v7 = vld [vmem:[#allocation2 + $0x68] sm:$0xff]  ;;  %v519_v8 = vld [vmem:[#allocation2 + $0x60] sm:$0xff]  ;;  %v520_v9 = vld [vmem:[#allocation2 + $0x70] sm:$0xff]  ;;  %v528_v3 = vpack.c.bf16 %v518_v4, %v517_v6 }
 0x161   : > { %1181 = vmatprep.subr.bf16.mxu0 %v1083_v49  ;;  %1260 = vmatprep.subr.bf16.mxu1 %v1083_v49  ;;  %v525_v10 = vpack.c.bf16 %v512_v7, %v511_v5  ;;  %v529_v11 = vpack.c.bf16 %v520_v9, %v519_v8  ;;  %v513_v0 = vld [vmem:[#allocation2 + $0x8] sm:$0xff]  ;;  %v521_v12 = vld [vmem:[#allocation2 + $0x78] sm:$0xff] }
 0x162   : > { %1195 = vmatprep.mubr.bf16.mxu0 %v523_v54  ;;  %1203 = vmatprep.mubr.bf16.mxu1 %v527_v55  ;;  %v514_v1 = vld [vmem:[#allocation2 + $0x48] sm:$0xff] }
 0x163   : > { %v522_v13 = vld [vmem:[#allocation2 + $0x28] sm:$0xff]  ;;  %v526_v14 = vpack.c.bf16 %v514_v1, %v513_v0 }
 0x164   : > { %1182 = vmatpush3.bf16.msra.mxu0 %v1083_v49  ;;  %1268 = vmatpush3.bf16.msra.mxu1 %v1083_v49  ;;  %v530_v15 = vpack.c.bf16 %v522_v13, %v521_v12 }
 0x165   : > { %1183 = vmatprep.subr.bf16.mxu0 %v1082_v56  ;;  %1261 = vmatprep.subr.bf16.mxu1 %v1082_v56 }
 0x168   : > { %1184 = vmatpush3.bf16.msra.mxu0 %v1082_v56  ;;  %1269 = vmatpush3.bf16.msra.mxu1 %v1082_v56 }
 0x169   : > { %1185 = vmatprep.subr.bf16.mxu0 %v1081_v57  ;;  %1262 = vmatprep.subr.bf16.mxu1 %v1081_v57 }
 0x16c   : > { %1186 = vmatpush3.bf16.msra.mxu0 %v1081_v57  ;;  %1270 = vmatpush3.bf16.msra.mxu1 %v1081_v57 }
 0x16d   : > { %1187 = vmatprep.subr.bf16.mxu0 %v1080_v58  ;;  %1263 = vmatprep.subr.bf16.mxu1 %v1080_v58 }
 0x170   : > { %1188 = vmatpush3.bf16.msra.mxu0 %v1080_v58  ;;  %1271 = vmatpush3.bf16.msra.mxu1 %v1080_v58 }
 0x171   : > { %1189 = vmatprep.subr.bf16.mxu0 %v1079_v59  ;;  %1264 = vmatprep.subr.bf16.mxu1 %v1079_v59 }
 0x174   : > { %1190 = vmatpush3.bf16.msra.mxu0 %v1079_v59  ;;  %1272 = vmatpush3.bf16.msra.mxu1 %v1079_v59 }
 0x175   : > { %1191 = vmatprep.subr.bf16.mxu0 %v1078_v60  ;;  %1265 = vmatprep.subr.bf16.mxu1 %v1078_v60 }
 0x178   : > { %1192 = vmatpush3.bf16.msra.mxu0 %v1078_v60  ;;  %1273 = vmatpush3.bf16.msra.mxu1 %v1078_v60 }
 0x179   : > { %1193 = vmatprep.subr.bf16.mxu0 %v1077_v61  ;;  %1266 = vmatprep.subr.bf16.mxu1 %v1077_v61 }
 0x17c   : > { %1194 = vmatpush3.bf16.msra.mxu0 %v1077_v61  ;;  %1274 = vmatpush3.bf16.msra.mxu1 %v1077_v61 }
 0x17f   : > { %1196 = vmatmul.mubr.bf16.vlgmr.msra.gmra.mxu0 %v524_v2  ;;  %1204 = vmatmul.mubr.bf16.vlgmr.msra.gmra.mxu1 %v528_v3 }
 0x180   : > { %1199 = vmatprep.mubr.bf16.mxu0 %v525_v10  ;;  %1207 = vmatprep.mubr.bf16.mxu1 %v529_v11 }
 0x187   : > { %1200 = vmatmul.mubr.bf16.gmra.mxu0 %v526_v14  ;;  %1208 = vmatmul.mubr.bf16.gmra.mxu1 %v530_v15 }
 0x23f   : > { %v1197_v16 = vpop.f32.mrf.mxu0  ;;  %v1205_v17 = vpop.f32.mrf.mxu1 }
 0x240   : > { %678 = vst [vmem:[#allocation2 + $0x58] sm:$0xff] %v1197_v16  ;;  %686 = vst [vmem:[#allocation2 + $0x10] sm:$0xff] %v1205_v17 }
 0x241   : > { %v613_v18 = vpop.f32.mrf.mxu0  ;;  %v645_v19 = vpop.f32.mrf.mxu1 }
 0x242   : > { %676 = vst [vmem:[#allocation2 + $0x30] sm:$0xff] %v613_v18  ;;  %684 = vst [vmem:[#allocation2 + $0x40] sm:$0xff] %v645_v19 }
 0x243   : > { %v1198_v20 = vpop.f32.mrf.mxu0  ;;  %v1206_v21 = vpop.f32.mrf.mxu1 }
 0x244   : > { %679 = vst [vmem:[#allocation2 + $0x18] sm:$0xff] %v1198_v20  ;;  %687 = vst [vmem:[#allocation2 + $0x38] sm:$0xff] %v1206_v21 }
 0x245   : > { %v616_v22 = vpop.f32.mrf.mxu0  ;;  %v648_v23 = vpop.f32.mrf.mxu1 }
 0x246   : > { %677 = vst [vmem:[#allocation2] sm:$0xff] %v616_v22  ;;  %685 = vst [vmem:[#allocation2 + $0x20] sm:$0xff] %v648_v23 }
 0x247   : > { %v1201_v24 = vpop.f32.mrf.mxu0  ;;  %v1209_v25 = vpop.f32.mrf.mxu1 }
 0x248   : > { %682 = vst [vmem:[#allocation2 + $0x8] sm:$0xff] %v1201_v24  ;;  %690 = vst [vmem:[#allocation2 + $0x78] sm:$0xff] %v1209_v25 }
 0x249   : > { %v629_v26 = vpop.f32.mrf.mxu0  ;;  %v661_v27 = vpop.f32.mrf.mxu1 }
 0x24a   : > { %680 = vst [vmem:[#allocation2 + $0x50] sm:$0xff] %v629_v26  ;;  %688 = vst [vmem:[#allocation2 + $0x60] sm:$0xff] %v661_v27 }
 0x24b   : > { %v1202_v28 = vpop.f32.mrf.mxu0  ;;  %v1210_v29 = vpop.f32.mrf.mxu1 }
 0x24c   : > { %683 = vst [vmem:[#allocation2 + $0x48] sm:$0xff] %v1202_v28  ;;  %691 = vst [vmem:[#allocation2 + $0x28] sm:$0xff] %v1210_v29 }
 0x24d   : > { %v632_v30 = vpop.f32.mrf.mxu0  ;;  %v664_v31 = vpop.f32.mrf.mxu1 }
 0x24e   : > { %681 = vst [vmem:[#allocation2 + $0x68] sm:$0xff] %v632_v30  ;;  %689 = vst [vmem:[#allocation2 + $0x70] sm:$0xff] %v664_v31 }
 0x24f PF: > { %v722_v32 = vld [vmem:[#allocation2 + $0x78] sm:$0xff]  ;;  %v718_v38 = vld [vmem:[#allocation2 + $0x10] sm:$0xff]  ;;  %v716_v40 = vld [vmem:[#allocation2 + $0x40] sm:$0xff]  ;;  %s1095_s25 = sshll.u32 %s1620_s19, 7  ;;  %s945_s5 = sshll.u32 %s1799_s26, 4  ;;  %s1861_s5 = int_to_ptr.vmem [resolvable:$true] %s945_s5 }
 0x250   : > { %v719_v39 = vld [vmem:[#allocation2 + $0x38] sm:$0xff]  ;;  %v717_v42 = vld [vmem:[#allocation2 + $0x20] sm:$0xff]  ;;  %v714_v46 = vld [vmem:[#allocation2 + $0x8] sm:$0xff]  ;;  %s1858_s14 = scalar_lea.hbm %s1910_s4, %s1095_s25  ;;  %s933_s19 = scalar_lea.sflag [#allocation5], %s1751_s10 }
 0x251   : > { %v720_v34 = vld [vmem:[#allocation2 + $0x60] sm:$0xff]  ;;  %v729_v41 = vpack.c.bf16 %v719_v39, %v718_v38  ;;  %v728_v45 = vpack.c.bf16 %v717_v42, %v716_v40  ;;  %v712_v49 = vld [vmem:[#allocation2 + $0x50] sm:$0xff]  ;;  %v710_v52 = vld [vmem:[#allocation2 + $0x58] sm:$0xff]  ;;  %s1491_s29 = scalar_lea.vmem %s1861_s5, 2048  ;;  %p1929_p10 = scmp.ne.s32.totalorder %s1917_s27, 0 }
 0x252   : > { %v1371_v43 = vld [vmem:[#allocation3] sm:$0xff]   ;;  %v711_v53 = vld [vmem:[#allocation2 + $0x18] sm:$0xff]  ;;  %v708_v55 = vld [vmem:[#allocation2 + $0x30] sm:$0xff]  ;;  %p1492_p9 = scmp.ne.s32.totalorder %s1861_s5, %s1491_s29  ;;  %s1570_s11 = smov [#allocation9]  }
 0x253   : > { %v723_v33 = vld [vmem:[#allocation2 + $0x28] sm:$0xff]  ;;  %v1372_v44 = vld [vmem:[#allocation3 + $0x20] sm:$0xff]   ;;  %1227 = vmatprep.mubr.bf16.mxu0 %v1371_v43  ;;  %v725_v54 = vpack.c.bf16 %v711_v53, %v710_v52  ;;  %v1375_v60 = vld [vmem:[#allocation3 + $0x10] sm:$0xff]   ;;  %s1495_s13 = sshll.u32 %s1570_s11, 4  ;;  %s1496_s13 = int_to_ptr.vmem [resolvable:$false] %s1495_s13 }
 0x254   : > { %v731_v35 = vpack.c.bf16 %v723_v33, %v722_v32  ;;  %v715_v47 = vld [vmem:[#allocation2 + $0x48] sm:$0xff]  ;;  %1235 = vmatprep.mubr.bf16.mxu1 %v1372_v44  ;;  %v709_v56 = vld [vmem:[#allocation2] sm:$0xff]  ;;  %v1376_v61 = vld [vmem:[#allocation3 + $0x30] sm:$0xff]   ;;  %p1493_p2 = pnand %p1492_p9, %p1929_p10  ;;  %s1497_s20 = scalar_lea.vmem %s1496_s13, 4096 }
 0x255   : > { %v721_v36 = vld [vmem:[#allocation2 + $0x70] sm:$0xff]  ;;  %v727_v48 = vpack.c.bf16 %v715_v47, %v714_v46  ;;  %v713_v50 = vld [vmem:[#allocation2 + $0x68] sm:$0xff]  ;;  %v724_v57 = vpack.c.bf16 %v709_v56, %v708_v55  ;;  %v1377_v62 = vld [vmem:[#allocation3 + $0x18] sm:$0xff]   ;;  %p1498_p0 = scmp.lt.s32.totalorder %s1861_s5, %s1496_s13  ;;  %p1499_p5 = scmp.lt.s32.totalorder %s1497_s20, %s1491_s29 }
 0x256   : > { %v730_v37 = vpack.c.bf16 %v721_v36, %v720_v34  ;;  %1211 = vmatprep.subr.bf16.mxu0 %v731_v35  ;;  %1275 = vmatprep.subr.bf16.mxu1 %v731_v35  ;;  %v726_v51 = vpack.c.bf16 %v713_v50, %v712_v49  ;;  %v1373_v58 = vld [vmem:[#allocation3 + $0x8] sm:$0xff]   ;;  %v1378_v63 = vld [vmem:[#allocation3 + $0x38] sm:$0xff]   ;;  %v1085_v6 = vld [vmem:[%s256_s7] ss:$0 sm:$0xff]  ;;  %p1494_p4 = pneg %p1493_p2 }
 0x257   : > { %1212 = vmatpush3.bf16.msra.mxu0 %v731_v35  ;;  %1283 = vmatpush3.bf16.msra.mxu1 %v731_v35  ;;  %v1374_v59 = vld [vmem:[#allocation3 + $0x28] sm:$0xff]   ;;  %p1500_p3 = por %p1499_p5, %p1498_p0 }
 0x258   : > { %1213 = vmatprep.subr.bf16.mxu0 %v730_v37  ;;  %1276 = vmatprep.subr.bf16.mxu1 %v730_v37 }
 0x259   : > { %p1501_p7 = pnand %p1500_p3, %p1494_p4 }
 0x25b   : > { %1214 = vmatpush3.bf16.msra.mxu0 %v730_v37  ;;  %1284 = vmatpush3.bf16.msra.mxu1 %v730_v37 }
 0x25c   : > { %1215 = vmatprep.subr.bf16.mxu0 %v729_v41  ;;  %1277 = vmatprep.subr.bf16.mxu1 %v729_v41 }
 0x25f   : > { %1216 = vmatpush3.bf16.msra.mxu0 %v729_v41  ;;  %1285 = vmatpush3.bf16.msra.mxu1 %v729_v41 }
 0x260   : > { %1217 = vmatprep.subr.bf16.mxu0 %v728_v45  ;;  %1278 = vmatprep.subr.bf16.mxu1 %v728_v45 }
 0x263   : > { %1218 = vmatpush3.bf16.msra.mxu0 %v728_v45  ;;  %1286 = vmatpush3.bf16.msra.mxu1 %v728_v45 }
 0x264   : > { %1219 = vmatprep.subr.bf16.mxu0 %v727_v48  ;;  %1279 = vmatprep.subr.bf16.mxu1 %v727_v48 }
 0x267   : > { %1220 = vmatpush3.bf16.msra.mxu0 %v727_v48  ;;  %1287 = vmatpush3.bf16.msra.mxu1 %v727_v48 }
 0x268   : > { %1221 = vmatprep.subr.bf16.mxu0 %v726_v51  ;;  %1280 = vmatprep.subr.bf16.mxu1 %v726_v51 }
 0x26b   : > { %1222 = vmatpush3.bf16.msra.mxu0 %v726_v51  ;;  %1288 = vmatpush3.bf16.msra.mxu1 %v726_v51 }
 0x26c   : > { %1223 = vmatprep.subr.bf16.mxu0 %v725_v54  ;;  %1281 = vmatprep.subr.bf16.mxu1 %v725_v54 }
 0x26f   : > { %1224 = vmatpush3.bf16.msra.mxu0 %v725_v54  ;;  %1289 = vmatpush3.bf16.msra.mxu1 %v725_v54 }
 0x270   : > { %1225 = vmatprep.subr.bf16.mxu0 %v724_v57  ;;  %1282 = vmatprep.subr.bf16.mxu1 %v724_v57 }
 0x273   : > { %1226 = vmatpush3.bf16.msra.mxu0 %v724_v57  ;;  %1290 = vmatpush3.bf16.msra.mxu1 %v724_v57 }
 0x276   : > { %1228 = vmatmul.mubr.bf16.vlgmr.msra.gmra.mxu0 %v1373_v58  ;;  %1236 = vmatmul.mubr.bf16.vlgmr.msra.gmra.mxu1 %v1374_v59 }
 0x277   : > { %1231 = vmatprep.mubr.bf16.mxu0 %v1375_v60  ;;  %1239 = vmatprep.mubr.bf16.mxu1 %v1376_v61 }
 0x27e   : > { %1232 = vmatmul.mubr.bf16.gmra.mxu0 %v1377_v62  ;;  %1240 = vmatmul.mubr.bf16.gmra.mxu1 %v1378_v63 }
 0x336   : > { %v1229_v4 = vpop.f32.mrf.mxu0  ;;  %v1237_v5 = vpop.f32.mrf.mxu1 }
 0x337   : > { %v830_v7 = vadd.f32 %v1229_v4, %v1085_v6  ;;  %v862_v8 = vadd.f32 %v1237_v5, %v1085_v6 }
 0x338   : > { %v821_v9 = vpop.f32.mrf.mxu0  ;;  %v853_v2 = vpop.f32.mrf.mxu1 }
 0x339   : > { %1379 = vtanh.f32 %v830_v7  ;;  %v822_v3 = vadd.f32 %v1085_v6, %v821_v9  ;;  %v854_v10 = vadd.f32 %v1085_v6, %v853_v2 }
 0x33a   : > { %1381 = vtanh.f32 %v862_v8  ;;  %v1230_v11 = vpop.f32.mrf.mxu0  ;;  %v1238_v0 = vpop.f32.mrf.mxu1 }
 0x33b   : > { %1383 = vtanh.f32 %v822_v3  ;;  %v833_v1 = vadd.f32 %v1230_v11, %v1085_v6  ;;  %v865_v12 = vadd.f32 %v1238_v0, %v1085_v6 }
 0x33c   : > { %1385 = vtanh.f32 %v854_v10  ;;  %v824_v13 = vpop.f32.mrf.mxu0  ;;  %v856_v14 = vpop.f32.mrf.mxu1 }
 0x33d   : > { %1387 = vtanh.f32 %v833_v1  ;;  %v825_v15 = vadd.f32 %v1085_v6, %v824_v13  ;;  %v857_v16 = vadd.f32 %v1085_v6, %v856_v14 }
 0x33e   : > { %1389 = vtanh.f32 %v865_v12  ;;  %v1233_v17 = vpop.f32.mrf.mxu0  ;;  %v1241_v18 = vpop.f32.mrf.mxu1 }
 0x33f   : > { %1391 = vtanh.f32 %v825_v15  ;;  %v846_v19 = vadd.f32 %v1233_v17, %v1085_v6  ;;  %v878_v20 = vadd.f32 %v1241_v18, %v1085_v6 }
 0x340   : > { %1393 = vtanh.f32 %v857_v16  ;;  %v837_v21 = vpop.f32.mrf.mxu0  ;;  %v869_v22 = vpop.f32.mrf.mxu1 }
 0x341   : > { %1395 = vtanh.f32 %v846_v19  ;;  %v838_v23 = vadd.f32 %v1085_v6, %v837_v21  ;;  %v870_v24 = vadd.f32 %v1085_v6, %v869_v22 }
 0x342   : > { %1397 = vtanh.f32 %v878_v20  ;;  %v1234_v25 = vpop.f32.mrf.mxu0  ;;  %v1242_v26 = vpop.f32.mrf.mxu1 }
 0x343   : > { %1399 = vtanh.f32 %v838_v23  ;;  %v849_v27 = vadd.f32 %v1234_v25, %v1085_v6  ;;  %v881_v28 = vadd.f32 %v1242_v26, %v1085_v6 }
 0x344   : > { %1401 = vtanh.f32 %v870_v24  ;;  %v840_v29 = vpop.f32.mrf.mxu0  ;;  %v872_v30 = vpop.f32.mrf.mxu1 }
 0x345   : > { %1403 = vtanh.f32 %v849_v27  ;;  %v841_v31 = vadd.f32 %v1085_v6, %v840_v29  ;;  %v873_v32 = vadd.f32 %v1085_v6, %v872_v30 }
 0x346   : > { %v1380_v33 = vpop.eup %1379  ;;  %1405 = vtanh.f32 %v881_v28 }
 0x347   : > { %v1382_v34 = vpop.eup %1381  ;;  %902 = vst [vmem:[%s1799_s26 + $0x10] sm:$0xff] %v1380_v33  ;;  %918 = vst [vmem:[#allocation2 + $0x58] sm:$0xff] %v1380_v33  ;;  %1407 = vtanh.f32 %v841_v31 }
 0x348   : > { %v1384_v35 = vpop.eup %1383  ;;  %910 = vst [vmem:[%s1799_s26 + $0x50] sm:$0xff] %v1382_v34  ;;  %926 = vst [vmem:[#allocation2 + $0x10] sm:$0xff] %v1382_v34  ;;  %1409 = vtanh.f32 %v873_v32 }
 0x349   : > { %v1386_v36 = vpop.eup %1385  ;;  %900 = vst [vmem:[%s1799_s26] sm:$0xff] %v1384_v35  ;;  %916 = vst [vmem:[#allocation2 + $0x30] sm:$0xff] %v1384_v35 }
 0x34a   : > { %v1388_v37 = vpop.eup %1387  ;;  %908 = vst [vmem:[%s1799_s26 + $0x40] sm:$0xff] %v1386_v36  ;;  %924 = vst [vmem:[#allocation2 + $0x40] sm:$0xff] %v1386_v36 }
 0x34b   : > { %v1390_v38 = vpop.eup %1389  ;;  %903 = vst [vmem:[%s1799_s26 + $0x18] sm:$0xff] %v1388_v37  ;;  %919 = vst [vmem:[#allocation2 + $0x18] sm:$0xff] %v1388_v37 }
 0x34c   : > { %v1392_v39 = vpop.eup %1391  ;;  %911 = vst [vmem:[%s1799_s26 + $0x58] sm:$0xff] %v1390_v38  ;;  %927 = vst [vmem:[#allocation2 + $0x38] sm:$0xff] %v1390_v38 }
 0x34d   : > { %v1394_v40 = vpop.eup %1393  ;;  %901 = vst [vmem:[%s1799_s26 + $0x8] sm:$0xff] %v1392_v39  ;;  %917 = vst [vmem:[#allocation2] sm:$0xff] %v1392_v39 }
 0x34e   : > { %v1396_v41 = vpop.eup %1395  ;;  %909 = vst [vmem:[%s1799_s26 + $0x48] sm:$0xff] %v1394_v40  ;;  %925 = vst [vmem:[#allocation2 + $0x20] sm:$0xff] %v1394_v40 }
 0x34f   : > { %v1398_v42 = vpop.eup %1397  ;;  %906 = vst [vmem:[%s1799_s26 + $0x30] sm:$0xff] %v1396_v41  ;;  %922 = vst [vmem:[#allocation2 + $0x8] sm:$0xff] %v1396_v41 }
 0x350   : > { %v1400_v43 = vpop.eup %1399  ;;  %914 = vst [vmem:[%s1799_s26 + $0x70] sm:$0xff] %v1398_v42  ;;  %930 = vst [vmem:[#allocation2 + $0x78] sm:$0xff] %v1398_v42 }
 0x351   : > { %v1402_v44 = vpop.eup %1401  ;;  %904 = vst [vmem:[%s1799_s26 + $0x20] sm:$0xff] %v1400_v43  ;;  %920 = vst [vmem:[#allocation2 + $0x50] sm:$0xff] %v1400_v43 }
 0x352   : > { %v1404_v45 = vpop.eup %1403  ;;  %912 = vst [vmem:[%s1799_s26 + $0x60] sm:$0xff] %v1402_v44  ;;  %928 = vst [vmem:[#allocation2 + $0x60] sm:$0xff] %v1402_v44 }
 0x353   : > { %v1406_v46 = vpop.eup %1405  ;;  %907 = vst [vmem:[%s1799_s26 + $0x38] sm:$0xff] %v1404_v45  ;;  %923 = vst [vmem:[#allocation2 + $0x48] sm:$0xff] %v1404_v45 }
 0x354   : > { %v1408_v47 = vpop.eup %1407  ;;  %915 = vst [vmem:[%s1799_s26 + $0x78] sm:$0xff] %v1406_v46  ;;  %931 = vst [vmem:[#allocation2 + $0x28] sm:$0xff] %v1406_v46 }
 0x355   : > { %v1410_v48 = vpop.eup %1409  ;;  %905 = vst [vmem:[%s1799_s26 + $0x28] sm:$0xff] %v1408_v47  ;;  %921 = vst [vmem:[#allocation2 + $0x68] sm:$0xff] %v1408_v47 }
 0x356   : > { %913 = vst [vmem:[%s1799_s26 + $0x68] sm:$0xff] %v1410_v48  ;;  %929 = vst [vmem:[#allocation2 + $0x70] sm:$0xff] %v1410_v48 }
 0x357   : > { %1504 = shalt.err (!%p1501_p7)
}
 0x358   : > { %s1505_s22 = scalar_lea.hbm %s1858_s14, 2048  ;;  %s1509_s7 = scalar_lea.hbm %s1910_s4, 6144 }
 0x359   : > { %p1506_p6 = scmp.ne.s32.totalorder %s1858_s14, %s1505_s22  ;;  %p1510_p11 = scmp.lt.s32.totalorder %s1858_s14, %s1910_s4 }
 0x35a   : > { %p1511_p12 = scmp.lt.s32.totalorder %s1509_s7, %s1505_s22 }
 0x35b   : > { %p1507_p13 = pnand %p1506_p6, %p1929_p10 }
 0x35c   : > { %p1512_p1 = por %p1511_p12, %p1510_p11 }
 0x35d   : > { %p1508_p8 = pneg %p1507_p13 }
 0x35f   : > { %p1513_p9 = pnand %p1512_p1, %p1508_p8 }
 0x361   : > { %1516 = shalt.err (!%p1513_p9)
}
 0x362   : > { %s1571_s12 = smov 128   ;;  %s1572_s25 = smov 384  }
 0x363   : > { %s1573_s6 = smov 8  }
 0x364   : > { %1301 = dma.vmem_to_hbm [thread:$0]  (%p1929_p10), %s1861_s5, 2048, %s1858_s14, %s933_s19, %s1571_s12, %s1572_s25, %s1573_s6  }
 0x365 PF: > { %p1323_p2 = scmp.ge.s32.totalorder %s1563_s18, 2  ;;  %s960_s8 = sand.u32 1, %s1551_s15  }
 0x366   : > { %p1930_p4 = scmp.ne.s32.totalorder %s1918_s28, 0  ;;  %s961_s29 = scalar_lea.sflag [#allocation5], %s960_s8 }
 0x368   : > { %p1315_p0 = pnand %p1323_p2, %p1930_p4 }
 0x36a   : > { %p1316_p5 = pneg %p1315_p0 }
 0x36c   : > { %1546 = dma.done.wait (%p1316_p5), %s961_s29, 2048  }
 0x36d   : > { %1548 = vsyncadd (%p1316_p5), %s961_s29, 4294965248  ;;  %p16_p3 = scmp.ge.s32.totalorder %s1624_s21, 5   ;;  %s1931_s15 = smov %s1555_s16 }
 0x36e   : > { %s1932_s16 = smov %s1559_s17  ;;  %s1933_s17 = smov %s1636_s24 }
 0x36f   : > { %s1934_s18 = smov %s1624_s21  ;;  %18 = sbr.rel (!%p16_p3) target bundleno = 5 (0x5), region = 99 }
 0x374   :  { %966 = vsyncpa [#allocation4], 1 }
 0x375   :  { %968 = vsyncpa [#allocation4 + $0x1], 1 }
 0x376   :  { %969 = vsyncpa [#allocation7], 1 }
 0x377   :  { %970 = vsyncpa [#allocation5], 1 }
 0x378   :  { %972 = vsyncpa [#allocation5 + $0x1], 1 }

// kernel: tpu_custom_call.1
= control target key start
LH: loop header
LB: loop body
LE: loop exit
PB: predicated region body
PF: predicated region fallthrough
CT: control target
= control target key end

     0   :  { %9 = vsyncpa [#allocation4], 0  ;;  %s1906_s0 = inlined_call_operand.hbm [shape: bf16[128,128], index: 0, kind: input, shape index: {}]   ;;  %s1907_s1 = inlined_call_operand.hbm [shape: bf16[128,128], index: 1, kind: input, shape index: {}]   ;;  %s1908_s2 = inlined_call_operand.hbm [shape: bf16[3,128,128], index: 2, kind: input, shape index: {}]   ;;  %s1909_s3 = inlined_call_operand.vmem [shape: f32[3,1,128], index: 3, kind: input, shape index: {}]   ;;  %s1910_s4 = inlined_call_operand.hbm [shape: f32[128,384], index: 4, kind: output, shape index: {}]  }
   0x1   :  { %10 = vsyncpa [#allocation7], 0 }
   0x2   :  { %11 = vsyncpa [#allocation5], 0 }
   0x3   :  { %13 = vsyncpa [#allocation5 + $0x1], 0  ;;  %s1599_s15 = smov 0   ;;  %s1601_s16 = smov 0  }
   0x4   :  { %s1603_s17 = smov 0   ;;  %s1605_s18 = smov 0  }
   0x5 LB: > { %s1620_s19 = sadd.s32 4294967295, %s1563_s18   ;;  %s1046_s20 = sadd.s32 4294967294, %s1563_s18   ;;  %s1563_s18 = sphi %s1605_s18, %s1934_s18   ;;  %s1559_s17 = sphi %s1603_s17, %s1933_s17   ;;  %s1555_s16 = sphi %s1601_s16, %s1932_s16   ;;  %s1551_s15 = sphi %s1599_s15, %s1931_s15  }
   0x6   : > { %s1624_s21 = sadd.s32 1, %s1563_s18   ;;  %s68_s22 = sadd.s32 1, %s1559_s17 }
   0x7   : > { %s65_s23 = ssub.s32 %s1563_s18, %s1624_s21  ;;  %p75_p0 = scmp.ne.s32.totalorder %s1559_s17, %s1555_s16 }
   0x8   : > { %p66_p1 = scmp.eq.s32.totalorder %s65_s23, 0  ;;  %p76_p2 = scmp.eq.s32.totalorder %s1563_s18, 0 }
   0x9   : > { %p81_p3 = scmp.ne.s32.totalorder %s1555_s16, %s1551_s15  ;;  %p1912_p4 = scmp.eq.s32.totalorder %s1620_s19, 0 }
   0xa   : > { %s1636_s24 = scalar_select %p66_p1, %s1559_s17, %s68_s22  }
   0xb   : > { %p1638_p5 = por %p76_p2, %p75_p0  ;;  %p1644_p6 = por %p1912_p4, %p81_p3 }
   0xc   : > { %p131_p7 = scmp.eq.s32.totalorder %s1620_s19, 2  ;;  %p137_p8 = scmp.eq.s32.totalorder %s1046_s20, 2 }
   0xd   : > { %s1916_s26 = scalar_select %p1644_p6, 1, 0 }
   0xe   : > { %p1047_p9 = scmp.ge.s32.totalorder %s1563_s18, 1  ;;  %p144_p10 = scmp.lt.s32.totalorder %s1563_s18, 4 }
   0xf   : > { %p1651_p11 = por %p131_p7, %p75_p0  ;;  %p1655_p12 = por %p137_p8, %p81_p3 }
  0x10   : > { %p1659_p13 = pnand %p1047_p9, %p144_p10  ;;  %s1565_s30 = smov [#allocation3]  }
  0x11   : > { %s1917_s27 = scalar_select %p1651_p11, 1, 0 }
  0x12   : > { %s1918_s28 = scalar_select %p1655_p12, 1, 0 }
  0x13   : > { %s1919_s29 = scalar_select %p1659_p13, 1, 0 }
  0x14   : > { %p1303_p2 = pneg %p1659_p13  ;;  %s156_s5 = sshll.u32 %s1565_s30, 4  ;;  %s157_s5 = int_to_ptr.vmem [resolvable:$true] %s156_s5 }
  0x15   : > { %p1320_p3 = scmp.lt.s32.totalorder %s1563_s18, 3  ;;  %s1566_s7 = smov [#allocation6]  }
  0x16   : > { %p1668_p0 = pnand %p1303_p2, %p1912_p4  ;;  %s169_s8 = sshll.u32 %s1566_s7, 4  ;;  %s170_s8 = int_to_ptr.vmem [resolvable:$true] %s169_s8 }
  0x17   : > { %s1422_s9 = scalar_lea.vmem %s157_s5, 1024  ;;  %p1430_p1 = scmp.lt.s32.totalorder %s157_s5, %s157_s5 }
  0x18   : > { %p1413_p7 = pneg %p1668_p0  ;;  %p1423_p8 = scmp.ne.s32.totalorder %s157_s5, %s1422_s9 }
  0x19   : > { %p1431_p12 = scmp.lt.s32.totalorder %s1422_s9, %s1422_s9 }
  0x1a   : > { %p1425_p9 = pnand %p1423_p8, %p1413_p7 }
  0x1b   : > { %p1432_p11 = por %p1431_p12, %p1430_p1 }
  0x1c   : > { %p1426_p10 = pneg %p1425_p9 }
  0x1e   : > { %p1433_p2 = pnand %p1432_p11, %p1426_p10 }
  0x20   : > { %1436 = shalt.err (!%p1433_p2)
}
  0x21   : > { %s1567_s10 = smov 64   ;;  %s1568_s11 = smov 4  }
  0x22   : > { %1306 = dma.hbm_to_vmem [thread:$0]  (!%p1668_p0), %s1906_s0, 1024, %s157_s5, [#allocation4], %s1567_s10, %s1567_s10, %s1568_s11  }
  0x23   : > { %p1690_p8 = pnand %p1320_p3, %p1638_p5  ;;  %s1448_s20 = scalar_lea.vmem %s170_s8, 1024 }
  0x24   : > { %p1449_p11 = scmp.ne.s32.totalorder %s170_s8, %s1448_s20  ;;  %p1456_p9 = scmp.lt.s32.totalorder %s170_s8, %s170_s8 }
  0x25   : > { %p1457_p10 = scmp.lt.s32.totalorder %s1448_s20, %s1448_s20 }
  0x26   : > { %p1451_p12 = pnand %p1449_p11, %p1413_p7 }
  0x27   : > { %p1458_p2 = por %p1457_p10, %p1456_p9 }
  0x28   : > { %p1452_p1 = pneg %p1451_p12 }
  0x2a   : > { %p1459_p4 = pnand %p1458_p2, %p1452_p1 }
  0x2c   : > { %1462 = shalt.err (!%p1459_p4)
}
  0x2d   : > { %1309 = dma.hbm_to_vmem [thread:$0]  (!%p1668_p0), %s1907_s1, 1024, %s170_s8, [#allocation7], %s1567_s10, %s1567_s10, %s1568_s11  }
  0x2e   : > { %s183_s25 = sand.u32 1, %s1563_s18   ;;  %s185_s30 = sand.u32 1, %s1559_s17  }
  0x2f   : > { %s1051_s5 = sshll.u32 %s185_s30, 6  ;;  %s1098_s7 = sshll.u32 %s1563_s18, 10 }
  0x30   : > { %s1711_s13 = scalar_lea.hbm %s1908_s2, %s1098_s7  ;;  %s187_s6 = scalar_lea.vmem [#allocation8], %s1051_s5 }
  0x31   : > { %s194_s20 = sshll.u32 %s187_s6, 4  ;;  %s1715_s22 = scalar_lea.sflag [#allocation4], %s183_s25  ;;  %s1713_s20 = int_to_ptr.vmem [resolvable:$true] %s194_s20 }
  0x32   : > { %s1463_s23 = scalar_lea.hbm %s1711_s13, 1024  ;;  %p1465_p5 = pneg %p1690_p8 }
  0x33   : > { %p1464_p4 = scmp.ne.s32.totalorder %s1711_s13, %s1463_s23  ;;  %s1468_s7 = scalar_lea.hbm %s1908_s2, 3072 }
  0x34   : > { %p1469_p7 = scmp.lt.s32.totalorder %s1711_s13, %s1908_s2  ;;  %p1470_p11 = scmp.lt.s32.totalorder %s1468_s7, %s1463_s23 }
  0x35   : > { %p1466_p0 = pnand %p1465_p5, %p1464_p4 }
  0x36   : > { %p1471_p12 = por %p1470_p11, %p1469_p7 }
  0x37   : > { %p1467_p3 = pneg %p1466_p0 }
  0x39   : > { %p1472_p1 = pnand %p1471_p12, %p1467_p3 }
  0x3b   : > { %1475 = shalt.err (!%p1472_p1)
}
  0x3c   : > { %s1476_s25 = scalar_lea.vmem %s1713_s20, 1024  ;;  %s1569_s5 = smov [#allocation8]  }
  0x3d   : > { %p1477_p9 = scmp.ne.s32.totalorder %s1713_s20, %s1476_s25  ;;  %s1481_s6 = sshll.u32 %s1569_s5, 4  ;;  %s1482_s6 = int_to_ptr.vmem [resolvable:$false] %s1481_s6 }
  0x3e   : > { %s1483_s8 = scalar_lea.vmem %s1482_s6, 2048  ;;  %p1484_p4 = scmp.lt.s32.totalorder %s1713_s20, %s1482_s6 }
  0x3f   : > { %p1479_p10 = pnand %p1477_p9, %p1465_p5  ;;  %p1485_p0 = scmp.lt.s32.totalorder %s1483_s8, %s1476_s25 }
  0x41   : > { %p1480_p2 = pneg %p1479_p10  ;;  %p1486_p6 = por %p1485_p0, %p1484_p4 }
  0x43   : > { %p1487_p13 = pnand %p1486_p6, %p1480_p2 }
  0x45   : > { %1490 = shalt.err (!%p1487_p13)
}
  0x46   : > { %1313 = dma.hbm_to_vmem [thread:$0]  (!%p1690_p8), %s1711_s13, 1024, %s1713_s20, %s1715_s22, %s1567_s10, %s1567_s10, %s1568_s11  }
  0x47   : > { %p1922_p5 = scmp.ne.s32.totalorder %s1919_s29, 0 }
  0x48   : > { %p1923_p3 = scmp.eq.s32.totalorder (!%p1922_p5), %s1620_s19, 0 }
  0x49   : > { %212 = sbr.rel (%p1922_p5) target bundleno = 869 (0x365), region = 36 }
  0x4e   : > { %1534 = dma.done.wait (%p1923_p3), [#allocation4], 1024   ;;  %p1924_p7 = pmov %p1923_p3 }
  0x4f   : > { %p1925_p6 = pmov %p1923_p3 }
  0x50   : > { %1536 = vsyncadd (%p1924_p7), [#allocation4], 4294966272 }
  0x51   : > { %1538 = dma.done.wait (%p1925_p6), [#allocation7], 1024   ;;  %p1926_p13 = pmov %p1923_p3 }
  0x52   : > { %s222_s14 = sand.u32 1, %s1620_s19   ;;  %s1751_s10 = sand.u32 1, %s1555_s16  }
  0x53   : > { %1540 = vsyncadd (%p1926_p13), [#allocation7], 4294966272  ;;  %s1057_s29 = sshll.u32 %s1751_s10, 6  ;;  %s223_s11 = scalar_lea.sflag [#allocation4], %s222_s14 }
  0x54   : > { %s226_s13 = scalar_lea.vmem [#allocation8], %s1057_s29  ;;  %p1927_p8 = scmp.ne.s32.totalorder %s1916_s26, 0 }
  0x56   : > { %1542 = dma.done.wait (%p1927_p8), %s223_s11, 1024  }
  0x57   : > { %1544 = vsyncadd (%p1927_p8), %s223_s11, 4294966272  ;;  %s1058_s20 = sshll.u32 %s1751_s10, 7  ;;  %p254_p11 = scmp.lt.s32.totalorder %s1620_s19, 2  ;;  %v1767_v0 = vld [vmem:[%s226_s13] sm:$0xf] }
  0x58   : > { %v1769_v1 = vld [vmem:[%s226_s13 + $0x4] sm:$0xf]  ;;  %v1771_v2 = vld [vmem:[%s226_s13 + $0x8] sm:$0xf]  ;;  %v1773_v3 = vld [vmem:[%s226_s13 + $0xc] sm:$0xf] }
  0x59   : > { %s1761_s22 = scalar_select %p254_p11, %s1620_s19, 2  ;;  %v1775_v4 = vld [vmem:[%s226_s13 + $0x10] sm:$0xf]  ;;  %v1777_v5 = vld [vmem:[%s226_s13 + $0x14] sm:$0xf] }
  0x5a   : > { %v1779_v6 = vld [vmem:[%s226_s13 + $0x18] sm:$0xf]  ;;  %v1781_v7 = vld [vmem:[%s226_s13 + $0x1c] sm:$0xf]  ;;  %v1783_v8 = vld [vmem:[%s226_s13 + $0x20] sm:$0xf] }
  0x5b   : > { %s256_s7 = scalar_lea.vmem %s1909_s3, %s1761_s22  ;;  %v1785_v9 = vld [vmem:[%s226_s13 + $0x24] sm:$0xf]  ;;  %v1787_v10 = vld [vmem:[%s226_s13 + $0x28] sm:$0xf]  ;;  %v1789_v11 = vld [vmem:[%s226_s13 + $0x2c] sm:$0xf] }
  0x5c   : > { %v1791_v12 = vld [vmem:[%s226_s13 + $0x30] sm:$0xf]  ;;  %v1793_v13 = vld [vmem:[%s226_s13 + $0x34] sm:$0xf]  ;;  %v1795_v14 = vld [vmem:[%s226_s13 + $0x38] sm:$0xf] }
  0x5d   : > { %v1797_v15 = vld [vmem:[%s226_s13 + $0x3c] sm:$0xf]  ;;  %s1799_s26 = scalar_lea.vmem [#allocation9], %s1058_s20  ;;  %p1928_p12 = scmp.ne.s32.totalorder %s1620_s19, 0 }
  0x5f   : > { %277 = sbr.rel (%p1928_p12) target bundleno = 342 (0x156), region = 52 }
  0x64   : > { %v1075_v16 = vcombine.low %v1795_v14, %v1797_v15  ;;  %v1074_v17 = vcombine.low %v1791_v12, %v1793_v13  ;;  %v1363_v18 = vld [vmem:[#allocation6] sm:$0xff]   ;;  %v1073_v20 = vcombine.low %v1787_v10, %v1789_v11  ;;  %v1072_v21 = vcombine.low %v1783_v8, %v1785_v9  ;;  %v1365_v26 = vld [vmem:[#allocation6 + $0x8] sm:$0xff]   ;;  %v1367_v28 = vld [vmem:[#allocation6 + $0x10] sm:$0xff]  }
  0x65   : > { %v1364_v19 = vld [vmem:[#allocation6 + $0x20] sm:$0xff]   ;;  %1163 = vmatprep.mubr.bf16.mxu0 %v1363_v18  ;;  %v1071_v22 = vcombine.low %v1779_v6, %v1781_v7  ;;  %v1070_v23 = vcombine.low %v1775_v4, %v1777_v5  ;;  %v1069_v24 = vcombine.low %v1771_v2, %v1773_v3  ;;  %v1068_v25 = vcombine.low %v1767_v0, %v1769_v1  ;;  %v1366_v27 = vld [vmem:[#allocation6 + $0x28] sm:$0xff]   ;;  %v1368_v29 = vld [vmem:[#allocation6 + $0x30] sm:$0xff]  }
  0x66   : > { %1147 = vmatprep.subr.bf16.mxu0 %v1075_v16  ;;  %1243 = vmatprep.subr.bf16.mxu1 %v1075_v16  ;;  %v1369_v30 = vld [vmem:[#allocation6 + $0x18] sm:$0xff]  }
  0x67   : > { %1148 = vmatpush3.bf16.msra.mxu0 %v1075_v16  ;;  %1251 = vmatpush3.bf16.msra.mxu1 %v1075_v16  ;;  %v1370_v31 = vld [vmem:[#allocation6 + $0x38] sm:$0xff]  }
  0x68   : > { %1149 = vmatprep.subr.bf16.mxu0 %v1074_v17  ;;  %1244 = vmatprep.subr.bf16.mxu1 %v1074_v17 }
  0x69   : > { %1171 = vmatprep.mubr.bf16.mxu1 %v1364_v19 }
  0x6b   : > { %1150 = vmatpush3.bf16.msra.mxu0 %v1074_v17  ;;  %1252 = vmatpush3.bf16.msra.mxu1 %v1074_v17 }
  0x6c   : > { %1151 = vmatprep.subr.bf16.mxu0 %v1073_v20  ;;  %1245 = vmatprep.subr.bf16.mxu1 %v1073_v20 }
  0x6f   : > { %1152 = vmatpush3.bf16.msra.mxu0 %v1073_v20  ;;  %1253 = vmatpush3.bf16.msra.mxu1 %v1073_v20 }
  0x70   : > { %1153 = vmatprep.subr.bf16.mxu0 %v1072_v21  ;;  %1246 = vmatprep.subr.bf16.mxu1 %v1072_v21 }
  0x73   : > { %1154 = vmatpush3.bf16.msra.mxu0 %v1072_v21  ;;  %1254 = vmatpush3.bf16.msra.mxu1 %v1072_v21 }
  0x74   : > { %1155 = vmatprep.subr.bf16.mxu0 %v1071_v22  ;;  %1247 = vmatprep.subr.bf16.mxu1 %v1071_v22 }
  0x77   : > { %1156 = vmatpush3.bf16.msra.mxu0 %v1071_v22  ;;  %1255 = vmatpush3.bf16.msra.mxu1 %v1071_v22 }
  0x78   : > { %1157 = vmatprep.subr.bf16.mxu0 %v1070_v23  ;;  %1248 = vmatprep.subr.bf16.mxu1 %v1070_v23 }
  0x7b   : > { %1158 = vmatpush3.bf16.msra.mxu0 %v1070_v23  ;;  %1256 = vmatpush3.bf16.msra.mxu1 %v1070_v23 }
  0x7c   : > { %1159 = vmatprep.subr.bf16.mxu0 %v1069_v24  ;;  %1249 = vmatprep.subr.bf16.mxu1 %v1069_v24 }
  0x7f   : > { %1160 = vmatpush3.bf16.msra.mxu0 %v1069_v24  ;;  %1257 = vmatpush3.bf16.msra.mxu1 %v1069_v24 }
  0x80   : > { %1161 = vmatprep.subr.bf16.mxu0 %v1068_v25  ;;  %1250 = vmatprep.subr.bf16.mxu1 %v1068_v25 }
  0x83   : > { %1162 = vmatpush3.bf16.msra.mxu0 %v1068_v25  ;;  %1258 = vmatpush3.bf16.msra.mxu1 %v1068_v25 }
  0x86   : > { %1164 = vmatmul.mubr.bf16.vlgmr.msra.gmra.mxu0 %v1365_v26  ;;  %1172 = vmatmul.mubr.bf16.vlgmr.msra.gmra.mxu1 %v1366_v27 }
  0x87   : > { %1167 = vmatprep.mubr.bf16.mxu0 %v1367_v28  ;;  %1175 = vmatprep.mubr.bf16.mxu1 %v1368_v29 }
  0x8e   : > { %1168 = vmatmul.mubr.bf16.gmra.mxu0 %v1369_v30  ;;  %1176 = vmatmul.mubr.bf16.gmra.mxu1 %v1370_v31 }
 0x146   : > { %v1165_v32 = vpop.f32.mrf.mxu0  ;;  %v1173_v33 = vpop.f32.mrf.mxu1 }
 0x147   : > { %489 = vst [vmem:[#allocation2 + $0x58] sm:$0xff] %v1165_v32  ;;  %497 = vst [vmem:[#allocation2 + $0x10] sm:$0xff] %v1173_v33 }
 0x148   : > { %v424_v34 = vpop.f32.mrf.mxu0  ;;  %v456_v35 = vpop.f32.mrf.mxu1 }
 0x149   : > { %487 = vst [vmem:[#allocation2 + $0x30] sm:$0xff] %v424_v34  ;;  %495 = vst [vmem:[#allocation2 + $0x40] sm:$0xff] %v456_v35 }
 0x14a   : > { %v1166_v36 = vpop.f32.mrf.mxu0  ;;  %v1174_v37 = vpop.f32.mrf.mxu1 }
 0x14b   : > { %490 = vst [vmem:[#allocation2 + $0x18] sm:$0xff] %v1166_v36  ;;  %498 = vst [vmem:[#allocation2 + $0x38] sm:$0xff] %v1174_v37 }
 0x14c   : > { %v427_v38 = vpop.f32.mrf.mxu0  ;;  %v459_v39 = vpop.f32.mrf.mxu1 }
 0x14d   : > { %488 = vst [vmem:[#allocation2] sm:$0xff] %v427_v38  ;;  %496 = vst [vmem:[#allocation2 + $0x20] sm:$0xff] %v459_v39 }
 0x14e   : > { %v1169_v40 = vpop.f32.mrf.mxu0  ;;  %v1177_v41 = vpop.f32.mrf.mxu1 }
 0x14f   : > { %493 = vst [vmem:[#allocation2 + $0x8] sm:$0xff] %v1169_v40  ;;  %501 = vst [vmem:[#allocation2 + $0x78] sm:$0xff] %v1177_v41 }
 0x150   : > { %v440_v42 = vpop.f32.mrf.mxu0  ;;  %v472_v43 = vpop.f32.mrf.mxu1 }
 0x151   : > { %491 = vst [vmem:[#allocation2 + $0x50] sm:$0xff] %v440_v42  ;;  %499 = vst [vmem:[#allocation2 + $0x60] sm:$0xff] %v472_v43 }
 0x152   : > { %v1170_v44 = vpop.f32.mrf.mxu0  ;;  %v1178_v45 = vpop.f32.mrf.mxu1 }
 0x153   : > { %494 = vst [vmem:[#allocation2 + $0x48] sm:$0xff] %v1170_v44  ;;  %502 = vst [vmem:[#allocation2 + $0x28] sm:$0xff] %v1178_v45 }
 0x154   : > { %v443_v46 = vpop.f32.mrf.mxu0  ;;  %v475_v47 = vpop.f32.mrf.mxu1 }
 0x155   : > { %492 = vst [vmem:[#allocation2 + $0x68] sm:$0xff] %v443_v46  ;;  %500 = vst [vmem:[#allocation2 + $0x70] sm:$0xff] %v475_v47 }
 0x156 PF: > { %p1076_p1 = scmp.le.s32.totalorder %s1620_s19, 0 }
 0x158   : > { %506 = sbr.rel (%p1076_p1) target bundleno = 591 (0x24f), region = 56 }
 0x15d   : > { %v1084_v48 = vcombine.low %v1795_v14, %v1797_v15  ;;  %v1083_v49 = vcombine.low %v1791_v12, %v1793_v13  ;;  %v507_v50 = vld [vmem:[#allocation2 + $0x30] sm:$0xff]  ;;  %v508_v51 = vld [vmem:[#allocation2] sm:$0xff]  ;;  %v1082_v56 = vcombine.low %v1787_v10, %v1789_v11  ;;  %v1081_v57 = vcombine.low %v1783_v8, %v1785_v9  ;;  %v509_v62 = vld [vmem:[#allocation2 + $0x58] sm:$0xff] }
 0x15e   : > { %v515_v52 = vld [vmem:[#allocation2 + $0x40] sm:$0xff]  ;;  %v523_v54 = vpack.c.bf16 %v508_v51, %v507_v50  ;;  %v1080_v58 = vcombine.low %v1779_v6, %v1781_v7  ;;  %v1079_v59 = vcombine.low %v1775_v4, %v1777_v5  ;;  %v1078_v60 = vcombine.low %v1771_v2, %v1773_v3  ;;  %v510_v63 = vld [vmem:[#allocation2 + $0x18] sm:$0xff]  ;;  %v517_v6 = vld [vmem:[#allocation2 + $0x10] sm:$0xff] }
 0x15f   : > { %v516_v53 = vld [vmem:[#allocation2 + $0x20] sm:$0xff]  ;;  %1179 = vmatprep.subr.bf16.mxu0 %v1084_v48  ;;  %1259 = vmatprep.subr.bf16.mxu1 %v1084_v48  ;;  %v1077_v61 = vcombine.low %v1767_v0, %v1769_v1  ;;  %v518_v4 = vld [vmem:[#allocation2 + $0x38] sm:$0xff]  ;;  %v511_v5 = vld [vmem:[#allocation2 + $0x50] sm:$0xff]  ;;  %v524_v2 = vpack.c.bf16 %v510_v63, %v509_v62 }
 0x160   : > { %v527_v55 = vpack.c.bf16 %v516_v53, %v515_v52  ;;  %1180 = vmatpush3.bf16.msra.mxu0 %v1084_v48  ;;  %1267 = vmatpush3.bf16.msra.mxu1 %v1084_v48  ;;  %v512_v7 = vld [vmem:[#allocation2 + $0x68] sm:$0xff]  ;;  %v519_v8 = vld [vmem:[#allocation2 + $0x60] sm:$0xff]  ;;  %v520_v9 = vld [vmem:[#allocation2 + $0x70] sm:$0xff]  ;;  %v528_v3 = vpack.c.bf16 %v518_v4, %v517_v6 }
 0x161   : > { %1181 = vmatprep.subr.bf16.mxu0 %v1083_v49  ;;  %1260 = vmatprep.subr.bf16.mxu1 %v1083_v49  ;;  %v525_v10 = vpack.c.bf16 %v512_v7, %v511_v5  ;;  %v529_v11 = vpack.c.bf16 %v520_v9, %v519_v8  ;;  %v513_v0 = vld [vmem:[#allocation2 + $0x8] sm:$0xff]  ;;  %v521_v12 = vld [vmem:[#allocation2 + $0x78] sm:$0xff] }
 0x162   : > { %1195 = vmatprep.mubr.bf16.mxu0 %v523_v54  ;;  %1203 = vmatprep.mubr.bf16.mxu1 %v527_v55  ;;  %v514_v1 = vld [vmem:[#allocation2 + $0x48] sm:$0xff] }
 0x163   : > { %v522_v13 = vld [vmem:[#allocation2 + $0x28] sm:$0xff]  ;;  %v526_v14 = vpack.c.bf16 %v514_v1, %v513_v0 }
 0x164   : > { %1182 = vmatpush3.bf16.msra.mxu0 %v1083_v49  ;;  %1268 = vmatpush3.bf16.msra.mxu1 %v1083_v49  ;;  %v530_v15 = vpack.c.bf16 %v522_v13, %v521_v12 }
 0x165   : > { %1183 = vmatprep.subr.bf16.mxu0 %v1082_v56  ;;  %1261 = vmatprep.subr.bf16.mxu1 %v1082_v56 }
 0x168   : > { %1184 = vmatpush3.bf16.msra.mxu0 %v1082_v56  ;;  %1269 = vmatpush3.bf16.msra.mxu1 %v1082_v56 }
 0x169   : > { %1185 = vmatprep.subr.bf16.mxu0 %v1081_v57  ;;  %1262 = vmatprep.subr.bf16.mxu1 %v1081_v57 }
 0x16c   : > { %1186 = vmatpush3.bf16.msra.mxu0 %v1081_v57  ;;  %1270 = vmatpush3.bf16.msra.mxu1 %v1081_v57 }
 0x16d   : > { %1187 = vmatprep.subr.bf16.mxu0 %v1080_v58  ;;  %1263 = vmatprep.subr.bf16.mxu1 %v1080_v58 }
 0x170   : > { %1188 = vmatpush3.bf16.msra.mxu0 %v1080_v58  ;;  %1271 = vmatpush3.bf16.msra.mxu1 %v1080_v58 }
 0x171   : > { %1189 = vmatprep.subr.bf16.mxu0 %v1079_v59  ;;  %1264 = vmatprep.subr.bf16.mxu1 %v1079_v59 }
 0x174   : > { %1190 = vmatpush3.bf16.msra.mxu0 %v1079_v59  ;;  %1272 = vmatpush3.bf16.msra.mxu1 %v1079_v59 }
 0x175   : > { %1191 = vmatprep.subr.bf16.mxu0 %v1078_v60  ;;  %1265 = vmatprep.subr.bf16.mxu1 %v1078_v60 }
 0x178   : > { %1192 = vmatpush3.bf16.msra.mxu0 %v1078_v60  ;;  %1273 = vmatpush3.bf16.msra.mxu1 %v1078_v60 }
 0x179   : > { %1193 = vmatprep.subr.bf16.mxu0 %v1077_v61  ;;  %1266 = vmatprep.subr.bf16.mxu1 %v1077_v61 }
 0x17c   : > { %1194 = vmatpush3.bf16.msra.mxu0 %v1077_v61  ;;  %1274 = vmatpush3.bf16.msra.mxu1 %v1077_v61 }
 0x17f   : > { %1196 = vmatmul.mubr.bf16.vlgmr.msra.gmra.mxu0 %v524_v2  ;;  %1204 = vmatmul.mubr.bf16.vlgmr.msra.gmra.mxu1 %v528_v3 }
 0x180   : > { %1199 = vmatprep.mubr.bf16.mxu0 %v525_v10  ;;  %1207 = vmatprep.mubr.bf16.mxu1 %v529_v11 }
 0x187   : > { %1200 = vmatmul.mubr.bf16.gmra.mxu0 %v526_v14  ;;  %1208 = vmatmul.mubr.bf16.gmra.mxu1 %v530_v15 }
 0x23f   : > { %v1197_v16 = vpop.f32.mrf.mxu0  ;;  %v1205_v17 = vpop.f32.mrf.mxu1 }
 0x240   : > { %678 = vst [vmem:[#allocation2 + $0x58] sm:$0xff] %v1197_v16  ;;  %686 = vst [vmem:[#allocation2 + $0x10] sm:$0xff] %v1205_v17 }
 0x241   : > { %v613_v18 = vpop.f32.mrf.mxu0  ;;  %v645_v19 = vpop.f32.mrf.mxu1 }
 0x242   : > { %676 = vst [vmem:[#allocation2 + $0x30] sm:$0xff] %v613_v18  ;;  %684 = vst [vmem:[#allocation2 + $0x40] sm:$0xff] %v645_v19 }
 0x243   : > { %v1198_v20 = vpop.f32.mrf.mxu0  ;;  %v1206_v21 = vpop.f32.mrf.mxu1 }
 0x244   : > { %679 = vst [vmem:[#allocation2 + $0x18] sm:$0xff] %v1198_v20  ;;  %687 = vst [vmem:[#allocation2 + $0x38] sm:$0xff] %v1206_v21 }
 0x245   : > { %v616_v22 = vpop.f32.mrf.mxu0  ;;  %v648_v23 = vpop.f32.mrf.mxu1 }
 0x246   : > { %677 = vst [vmem:[#allocation2] sm:$0xff] %v616_v22  ;;  %685 = vst [vmem:[#allocation2 + $0x20] sm:$0xff] %v648_v23 }
 0x247   : > { %v1201_v24 = vpop.f32.mrf.mxu0  ;;  %v1209_v25 = vpop.f32.mrf.mxu1 }
 0x248   : > { %682 = vst [vmem:[#allocation2 + $0x8] sm:$0xff] %v1201_v24  ;;  %690 = vst [vmem:[#allocation2 + $0x78] sm:$0xff] %v1209_v25 }
 0x249   : > { %v629_v26 = vpop.f32.mrf.mxu0  ;;  %v661_v27 = vpop.f32.mrf.mxu1 }
 0x24a   : > { %680 = vst [vmem:[#allocation2 + $0x50] sm:$0xff] %v629_v26  ;;  %688 = vst [vmem:[#allocation2 + $0x60] sm:$0xff] %v661_v27 }
 0x24b   : > { %v1202_v28 = vpop.f32.mrf.mxu0  ;;  %v1210_v29 = vpop.f32.mrf.mxu1 }
 0x24c   : > { %683 = vst [vmem:[#allocation2 + $0x48] sm:$0xff] %v1202_v28  ;;  %691 = vst [vmem:[#allocation2 + $0x28] sm:$0xff] %v1210_v29 }
 0x24d   : > { %v632_v30 = vpop.f32.mrf.mxu0  ;;  %v664_v31 = vpop.f32.mrf.mxu1 }
 0x24e   : > { %681 = vst [vmem:[#allocation2 + $0x68] sm:$0xff] %v632_v30  ;;  %689 = vst [vmem:[#allocation2 + $0x70] sm:$0xff] %v664_v31 }
 0x24f PF: > { %v722_v32 = vld [vmem:[#allocation2 + $0x78] sm:$0xff]  ;;  %v718_v38 = vld [vmem:[#allocation2 + $0x10] sm:$0xff]  ;;  %v716_v40 = vld [vmem:[#allocation2 + $0x40] sm:$0xff]  ;;  %s1095_s25 = sshll.u32 %s1620_s19, 7  ;;  %s945_s5 = sshll.u32 %s1799_s26, 4  ;;  %s1861_s5 = int_to_ptr.vmem [resolvable:$true] %s945_s5 }
 0x250   : > { %v719_v39 = vld [vmem:[#allocation2 + $0x38] sm:$0xff]  ;;  %v717_v42 = vld [vmem:[#allocation2 + $0x20] sm:$0xff]  ;;  %v714_v46 = vld [vmem:[#allocation2 + $0x8] sm:$0xff]  ;;  %s1858_s14 = scalar_lea.hbm %s1910_s4, %s1095_s25  ;;  %s933_s19 = scalar_lea.sflag [#allocation5], %s1751_s10 }
 0x251   : > { %v720_v34 = vld [vmem:[#allocation2 + $0x60] sm:$0xff]  ;;  %v729_v41 = vpack.c.bf16 %v719_v39, %v718_v38  ;;  %v728_v45 = vpack.c.bf16 %v717_v42, %v716_v40  ;;  %v712_v49 = vld [vmem:[#allocation2 + $0x50] sm:$0xff]  ;;  %v710_v52 = vld [vmem:[#allocation2 + $0x58] sm:$0xff]  ;;  %s1491_s29 = scalar_lea.vmem %s1861_s5, 2048  ;;  %p1929_p10 = scmp.ne.s32.totalorder %s1917_s27, 0 }
 0x252   : > { %v1371_v43 = vld [vmem:[#allocation3] sm:$0xff]   ;;  %v711_v53 = vld [vmem:[#allocation2 + $0x18] sm:$0xff]  ;;  %v708_v55 = vld [vmem:[#allocation2 + $0x30] sm:$0xff]  ;;  %p1492_p9 = scmp.ne.s32.totalorder %s1861_s5, %s1491_s29  ;;  %s1570_s11 = smov [#allocation9]  }
 0x253   : > { %v723_v33 = vld [vmem:[#allocation2 + $0x28] sm:$0xff]  ;;  %v1372_v44 = vld [vmem:[#allocation3 + $0x20] sm:$0xff]   ;;  %1227 = vmatprep.mubr.bf16.mxu0 %v1371_v43  ;;  %v725_v54 = vpack.c.bf16 %v711_v53, %v710_v52  ;;  %v1375_v60 = vld [vmem:[#allocation3 + $0x10] sm:$0xff]   ;;  %s1495_s13 = sshll.u32 %s1570_s11, 4  ;;  %s1496_s13 = int_to_ptr.vmem [resolvable:$false] %s1495_s13 }
 0x254   : > { %v731_v35 = vpack.c.bf16 %v723_v33, %v722_v32  ;;  %v715_v47 = vld [vmem:[#allocation2 + $0x48] sm:$0xff]  ;;  %1235 = vmatprep.mubr.bf16.mxu1 %v1372_v44  ;;  %v709_v56 = vld [vmem:[#allocation2] sm:$0xff]  ;;  %v1376_v61 = vld [vmem:[#allocation3 + $0x30] sm:$0xff]   ;;  %p1493_p2 = pnand %p1492_p9, %p1929_p10  ;;  %s1497_s20 = scalar_lea.vmem %s1496_s13, 4096 }
 0x255   : > { %v721_v36 = vld [vmem:[#allocation2 + $0x70] sm:$0xff]  ;;  %v727_v48 = vpack.c.bf16 %v715_v47, %v714_v46  ;;  %v713_v50 = vld [vmem:[#allocation2 + $0x68] sm:$0xff]  ;;  %v724_v57 = vpack.c.bf16 %v709_v56, %v708_v55  ;;  %v1377_v62 = vld [vmem:[#allocation3 + $0x18] sm:$0xff]   ;;  %p1498_p0 = scmp.lt.s32.totalorder %s1861_s5, %s1496_s13  ;;  %p1499_p5 = scmp.lt.s32.totalorder %s1497_s20, %s1491_s29 }
 0x256   : > { %v730_v37 = vpack.c.bf16 %v721_v36, %v720_v34  ;;  %1211 = vmatprep.subr.bf16.mxu0 %v731_v35  ;;  %1275 = vmatprep.subr.bf16.mxu1 %v731_v35  ;;  %v726_v51 = vpack.c.bf16 %v713_v50, %v712_v49  ;;  %v1373_v58 = vld [vmem:[#allocation3 + $0x8] sm:$0xff]   ;;  %v1378_v63 = vld [vmem:[#allocation3 + $0x38] sm:$0xff]   ;;  %v1085_v6 = vld [vmem:[%s256_s7] ss:$0 sm:$0xff]  ;;  %p1494_p4 = pneg %p1493_p2 }
 0x257   : > { %1212 = vmatpush3.bf16.msra.mxu0 %v731_v35  ;;  %1283 = vmatpush3.bf16.msra.mxu1 %v731_v35  ;;  %v1374_v59 = vld [vmem:[#allocation3 + $0x28] sm:$0xff]   ;;  %p1500_p3 = por %p1499_p5, %p1498_p0 }
 0x258   : > { %1213 = vmatprep.subr.bf16.mxu0 %v730_v37  ;;  %1276 = vmatprep.subr.bf16.mxu1 %v730_v37 }
 0x259   : > { %p1501_p7 = pnand %p1500_p3, %p1494_p4 }
 0x25b   : > { %1214 = vmatpush3.bf16.msra.mxu0 %v730_v37  ;;  %1284 = vmatpush3.bf16.msra.mxu1 %v730_v37 }
 0x25c   : > { %1215 = vmatprep.subr.bf16.mxu0 %v729_v41  ;;  %1277 = vmatprep.subr.bf16.mxu1 %v729_v41 }
 0x25f   : > { %1216 = vmatpush3.bf16.msra.mxu0 %v729_v41  ;;  %1285 = vmatpush3.bf16.msra.mxu1 %v729_v41 }
 0x260   : > { %1217 = vmatprep.subr.bf16.mxu0 %v728_v45  ;;  %1278 = vmatprep.subr.bf16.mxu1 %v728_v45 }
 0x263   : > { %1218 = vmatpush3.bf16.msra.mxu0 %v728_v45  ;;  %1286 = vmatpush3.bf16.msra.mxu1 %v728_v45 }
 0x264   : > { %1219 = vmatprep.subr.bf16.mxu0 %v727_v48  ;;  %1279 = vmatprep.subr.bf16.mxu1 %v727_v48 }
 0x267   : > { %1220 = vmatpush3.bf16.msra.mxu0 %v727_v48  ;;  %1287 = vmatpush3.bf16.msra.mxu1 %v727_v48 }
 0x268   : > { %1221 = vmatprep.subr.bf16.mxu0 %v726_v51  ;;  %1280 = vmatprep.subr.bf16.mxu1 %v726_v51 }
 0x26b   : > { %1222 = vmatpush3.bf16.msra.mxu0 %v726_v51  ;;  %1288 = vmatpush3.bf16.msra.mxu1 %v726_v51 }
 0x26c   : > { %1223 = vmatprep.subr.bf16.mxu0 %v725_v54  ;;  %1281 = vmatprep.subr.bf16.mxu1 %v725_v54 }
 0x26f   : > { %1224 = vmatpush3.bf16.msra.mxu0 %v725_v54  ;;  %1289 = vmatpush3.bf16.msra.mxu1 %v725_v54 }
 0x270   : > { %1225 = vmatprep.subr.bf16.mxu0 %v724_v57  ;;  %1282 = vmatprep.subr.bf16.mxu1 %v724_v57 }
 0x273   : > { %1226 = vmatpush3.bf16.msra.mxu0 %v724_v57  ;;  %1290 = vmatpush3.bf16.msra.mxu1 %v724_v57 }
 0x276   : > { %1228 = vmatmul.mubr.bf16.vlgmr.msra.gmra.mxu0 %v1373_v58  ;;  %1236 = vmatmul.mubr.bf16.vlgmr.msra.gmra.mxu1 %v1374_v59 }
 0x277   : > { %1231 = vmatprep.mubr.bf16.mxu0 %v1375_v60  ;;  %1239 = vmatprep.mubr.bf16.mxu1 %v1376_v61 }
 0x27e   : > { %1232 = vmatmul.mubr.bf16.gmra.mxu0 %v1377_v62  ;;  %1240 = vmatmul.mubr.bf16.gmra.mxu1 %v1378_v63 }
 0x336   : > { %v1229_v4 = vpop.f32.mrf.mxu0  ;;  %v1237_v5 = vpop.f32.mrf.mxu1 }
 0x337   : > { %v830_v7 = vadd.f32 %v1229_v4, %v1085_v6  ;;  %v862_v8 = vadd.f32 %v1237_v5, %v1085_v6 }
 0x338   : > { %v821_v9 = vpop.f32.mrf.mxu0  ;;  %v853_v2 = vpop.f32.mrf.mxu1 }
 0x339   : > { %1379 = vtanh.f32 %v830_v7  ;;  %v822_v3 = vadd.f32 %v1085_v6, %v821_v9  ;;  %v854_v10 = vadd.f32 %v1085_v6, %v853_v2 }
 0x33a   : > { %1381 = vtanh.f32 %v862_v8  ;;  %v1230_v11 = vpop.f32.mrf.mxu0  ;;  %v1238_v0 = vpop.f32.mrf.mxu1 }
 0x33b   : > { %1383 = vtanh.f32 %v822_v3  ;;  %v833_v1 = vadd.f32 %v1230_v11, %v1085_v6  ;;  %v865_v12 = vadd.f32 %v1238_v0, %v1085_v6 }
 0x33c   : > { %1385 = vtanh.f32 %v854_v10  ;;  %v824_v13 = vpop.f32.mrf.mxu0  ;;  %v856_v14 = vpop.f32.mrf.mxu1 }
 0x33d   : > { %1387 = vtanh.f32 %v833_v1  ;;  %v825_v15 = vadd.f32 %v1085_v6, %v824_v13  ;;  %v857_v16 = vadd.f32 %v1085_v6, %v856_v14 }
 0x33e   : > { %1389 = vtanh.f32 %v865_v12  ;;  %v1233_v17 = vpop.f32.mrf.mxu0  ;;  %v1241_v18 = vpop.f32.mrf.mxu1 }
 0x33f   : > { %1391 = vtanh.f32 %v825_v15  ;;  %v846_v19 = vadd.f32 %v1233_v17, %v1085_v6  ;;  %v878_v20 = vadd.f32 %v1241_v18, %v1085_v6 }
 0x340   : > { %1393 = vtanh.f32 %v857_v16  ;;  %v837_v21 = vpop.f32.mrf.mxu0  ;;  %v869_v22 = vpop.f32.mrf.mxu1 }
 0x341   : > { %1395 = vtanh.f32 %v846_v19  ;;  %v838_v23 = vadd.f32 %v1085_v6, %v837_v21  ;;  %v870_v24 = vadd.f32 %v1085_v6, %v869_v22 }
 0x342   : > { %1397 = vtanh.f32 %v878_v20  ;;  %v1234_v25 = vpop.f32.mrf.mxu0  ;;  %v1242_v26 = vpop.f32.mrf.mxu1 }
 0x343   : > { %1399 = vtanh.f32 %v838_v23  ;;  %v849_v27 = vadd.f32 %v1234_v25, %v1085_v6  ;;  %v881_v28 = vadd.f32 %v1242_v26, %v1085_v6 }
 0x344   : > { %1401 = vtanh.f32 %v870_v24  ;;  %v840_v29 = vpop.f32.mrf.mxu0  ;;  %v872_v30 = vpop.f32.mrf.mxu1 }
 0x345   : > { %1403 = vtanh.f32 %v849_v27  ;;  %v841_v31 = vadd.f32 %v1085_v6, %v840_v29  ;;  %v873_v32 = vadd.f32 %v1085_v6, %v872_v30 }
 0x346   : > { %v1380_v33 = vpop.eup %1379  ;;  %1405 = vtanh.f32 %v881_v28 }
 0x347   : > { %v1382_v34 = vpop.eup %1381  ;;  %902 = vst [vmem:[%s1799_s26 + $0x10] sm:$0xff] %v1380_v33  ;;  %918 = vst [vmem:[#allocation2 + $0x58] sm:$0xff] %v1380_v33  ;;  %1407 = vtanh.f32 %v841_v31 }
 0x348   : > { %v1384_v35 = vpop.eup %1383  ;;  %910 = vst [vmem:[%s1799_s26 + $0x50] sm:$0xff] %v1382_v34  ;;  %926 = vst [vmem:[#allocation2 + $0x10] sm:$0xff] %v1382_v34  ;;  %1409 = vtanh.f32 %v873_v32 }
 0x349   : > { %v1386_v36 = vpop.eup %1385  ;;  %900 = vst [vmem:[%s1799_s26] sm:$0xff] %v1384_v35  ;;  %916 = vst [vmem:[#allocation2 + $0x30] sm:$0xff] %v1384_v35 }
 0x34a   : > { %v1388_v37 = vpop.eup %1387  ;;  %908 = vst [vmem:[%s1799_s26 + $0x40] sm:$0xff] %v1386_v36  ;;  %924 = vst [vmem:[#allocation2 + $0x40] sm:$0xff] %v1386_v36 }
 0x34b   : > { %v1390_v38 = vpop.eup %1389  ;;  %903 = vst [vmem:[%s1799_s26 + $0x18] sm:$0xff] %v1388_v37  ;;  %919 = vst [vmem:[#allocation2 + $0x18] sm:$0xff] %v1388_v37 }
 0x34c   : > { %v1392_v39 = vpop.eup %1391  ;;  %911 = vst [vmem:[%s1799_s26 + $0x58] sm:$0xff] %v1390_v38  ;;  %927 = vst [vmem:[#allocation2 + $0x38] sm:$0xff] %v1390_v38 }
 0x34d   : > { %v1394_v40 = vpop.eup %1393  ;;  %901 = vst [vmem:[%s1799_s26 + $0x8] sm:$0xff] %v1392_v39  ;;  %917 = vst [vmem:[#allocation2] sm:$0xff] %v1392_v39 }
 0x34e   : > { %v1396_v41 = vpop.eup %1395  ;;  %909 = vst [vmem:[%s1799_s26 + $0x48] sm:$0xff] %v1394_v40  ;;  %925 = vst [vmem:[#allocation2 + $0x20] sm:$0xff] %v1394_v40 }
 0x34f   : > { %v1398_v42 = vpop.eup %1397  ;;  %906 = vst [vmem:[%s1799_s26 + $0x30] sm:$0xff] %v1396_v41  ;;  %922 = vst [vmem:[#allocation2 + $0x8] sm:$0xff] %v1396_v41 }
 0x350   : > { %v1400_v43 = vpop.eup %1399  ;;  %914 = vst [vmem:[%s1799_s26 + $0x70] sm:$0xff] %v1398_v42  ;;  %930 = vst [vmem:[#allocation2 + $0x78] sm:$0xff] %v1398_v42 }
 0x351   : > { %v1402_v44 = vpop.eup %1401  ;;  %904 = vst [vmem:[%s1799_s26 + $0x20] sm:$0xff] %v1400_v43  ;;  %920 = vst [vmem:[#allocation2 + $0x50] sm:$0xff] %v1400_v43 }
 0x352   : > { %v1404_v45 = vpop.eup %1403  ;;  %912 = vst [vmem:[%s1799_s26 + $0x60] sm:$0xff] %v1402_v44  ;;  %928 = vst [vmem:[#allocation2 + $0x60] sm:$0xff] %v1402_v44 }
 0x353   : > { %v1406_v46 = vpop.eup %1405  ;;  %907 = vst [vmem:[%s1799_s26 + $0x38] sm:$0xff] %v1404_v45  ;;  %923 = vst [vmem:[#allocation2 + $0x48] sm:$0xff] %v1404_v45 }
 0x354   : > { %v1408_v47 = vpop.eup %1407  ;;  %915 = vst [vmem:[%s1799_s26 + $0x78] sm:$0xff] %v1406_v46  ;;  %931 = vst [vmem:[#allocation2 + $0x28] sm:$0xff] %v1406_v46 }
 0x355   : > { %v1410_v48 = vpop.eup %1409  ;;  %905 = vst [vmem:[%s1799_s26 + $0x28] sm:$0xff] %v1408_v47  ;;  %921 = vst [vmem:[#allocation2 + $0x68] sm:$0xff] %v1408_v47 }
 0x356   : > { %913 = vst [vmem:[%s1799_s26 + $0x68] sm:$0xff] %v1410_v48  ;;  %929 = vst [vmem:[#allocation2 + $0x70] sm:$0xff] %v1410_v48 }
 0x357   : > { %1504 = shalt.err (!%p1501_p7)
}
 0x358   : > { %s1505_s22 = scalar_lea.hbm %s1858_s14, 2048  ;;  %s1509_s7 = scalar_lea.hbm %s1910_s4, 6144 }
 0x359   : > { %p1506_p6 = scmp.ne.s32.totalorder %s1858_s14, %s1505_s22  ;;  %p1510_p11 = scmp.lt.s32.totalorder %s1858_s14, %s1910_s4 }
 0x35a   : > { %p1511_p12 = scmp.lt.s32.totalorder %s1509_s7, %s1505_s22 }
 0x35b   : > { %p1507_p13 = pnand %p1506_p6, %p1929_p10 }
 0x35c   : > { %p1512_p1 = por %p1511_p12, %p1510_p11 }
 0x35d   : > { %p1508_p8 = pneg %p1507_p13 }
 0x35f   : > { %p1513_p9 = pnand %p1512_p1, %p1508_p8 }
 0x361   : > { %1516 = shalt.err (!%p1513_p9)
}
 0x362   : > { %s1571_s12 = smov 128   ;;  %s1572_s25 = smov 384  }
 0x363   : > { %s1573_s6 = smov 8  }
 0x364   : > { %1301 = dma.vmem_to_hbm [thread:$0]  (%p1929_p10), %s1861_s5, 2048, %s1858_s14, %s933_s19, %s1571_s12, %s1572_s25, %s1573_s6  }
 0x365 PF: > { %p1323_p2 = scmp.ge.s32.totalorder %s1563_s18, 2  ;;  %s960_s8 = sand.u32 1, %s1551_s15  }
 0x366   : > { %p1930_p4 = scmp.ne.s32.totalorder %s1918_s28, 0  ;;  %s961_s29 = scalar_lea.sflag [#allocation5], %s960_s8 }
 0x368   : > { %p1315_p0 = pnand %p1323_p2, %p1930_p4 }
 0x36a   : > { %p1316_p5 = pneg %p1315_p0 }
 0x36c   : > { %1546 = dma.done.wait (%p1316_p5), %s961_s29, 2048  }
 0x36d   : > { %1548 = vsyncadd (%p1316_p5), %s961_s29, 4294965248  ;;  %p16_p3 = scmp.ge.s32.totalorder %s1624_s21, 5   ;;  %s1931_s15 = smov %s1555_s16 }
 0x36e   : > { %s1932_s16 = smov %s1559_s17  ;;  %s1933_s17 = smov %s1636_s24 }
 0x36f   : > { %s1934_s18 = smov %s1624_s21  ;;  %18 = sbr.rel (!%p16_p3) target bundleno = 5 (0x5), region = 99 }
 0x374   :  { %966 = vsyncpa [#allocation4], 1 }
 0x375   :  { %968 = vsyncpa [#allocation4 + $0x1], 1 }
 0x376   :  { %969 = vsyncpa [#allocation7], 1 }
 0x377   :  { %970 = vsyncpa [#allocation5], 1 }
 0x378   :  { %972 = vsyncpa [#allocation5 + $0x1], 1 }

</bundles_post_ra>
